<compile_context>
chip_gen: v7x
topology: tpu7x:2x2x1
jax: 0.10.0
libtpu: 0.0.40
codegen_flags: <defaults>
</compile_context>

<pallas_src>
import math
from functools import partial

import jax
import jax.numpy as jnp
from jax import lax
from jax.experimental import pallas as pl
from jax.experimental.pallas import tpu as pltpu


# ----------------------------------------------------------------------------
# Pallas kernel: fused multi-layer LSTM decoder, single invocation, all-VMEM.
# ----------------------------------------------------------------------------
def _make_decoder_kernel(num_layers, T, B, H):
    def kernel(*refs):
        x_ref = refs[0]                               # (T, B, Din)   time-major input
        w_refs = refs[1:1 + 3 * num_layers]           # per layer: W_ih^T, W_hh^T, bias
        lens_ref = refs[1 + 3 * num_layers]           # (B, 1) int32
        out_ref = refs[2 + 3 * num_layers]            # (T, B, H)     final output (VMEM resident)
        seq_sc = refs[3 + 3 * num_layers]             # (T, B, H)     inter-layer sequence scratch
        xg_sc = refs[4 + 3 * num_layers]              # (T, B, 4H)    precomputed input projection

        lens = lens_ref[...]                          # (B, 1)

        for layer in range(num_layers):
            w_ih = w_refs[3 * layer][...]             # (Din_l, 4H)
            w_hh = w_refs[3 * layer + 1][...]         # (H, 4H)
            bias = w_refs[3 * layer + 2][...]         # (1, 4H)

            xin = x_ref[...] if layer == 0 else seq_sc[...]   # (T, B, Din_l)
            din = xin.shape[-1]

            # One dense MXU pass for the whole sequence's input projection (+ fused bias).
            xg = jnp.dot(xin.reshape(T * B, din), w_ih,
                         preferred_element_type=jnp.float32) + bias
            xg_sc[...] = xg.reshape(T, B, 4 * H)

            is_last = layer == num_layers - 1
            dst = out_ref if is_last else seq_sc

            def step(t, carry):
                h, c = carry
                # Only the recurrent matmul stays inside the time loop.
                gates = xg_sc[t] + jnp.dot(h, w_hh, preferred_element_type=jnp.float32)
                # Full-vreg (4H = 128 lanes) activations, then static slices.
                sig = jax.nn.sigmoid(gates)
                tnh = jnp.tanh(gates)
                i_g = sig[:, 0 * H:1 * H]
                f_g = sig[:, 1 * H:2 * H]
                g_g = tnh[:, 2 * H:3 * H]
                o_g = sig[:, 3 * H:4 * H]
                c_new = f_g * c + i_g * g_g
                h_new = o_g * jnp.tanh(c_new)
                if is_last:
                    # pad_packed_sequence(..., total_length=seq_len): zero past each length.
                    h_out = jnp.where(lens > t, h_new, 0.0)
                else:
                    h_out = h_new
                dst[t] = h_out.astype(dst.dtype)
                return h_new, c_new

            h0 = jnp.zeros((B, H), jnp.float32)       # PyTorch default: h0 = c0 = 0
            c0 = jnp.zeros((B, H), jnp.float32)
            lax.fori_loop(0, T, step, (h0, c0), unroll=True)

    return kernel


@partial(jax.jit, static_argnames=("num_layers", "output_size"))
def _decoder_forward(x, lens, weights, *, num_layers, output_size):
    """x: batch-first (B, T, hidden_size). Returns batch-first (B, T, output_size)."""
    B, T, _ = x.shape
    H = output_size
    x_tm = jnp.transpose(x, (1, 0, 2))                # time-major (T, B, Din)
    lens2d = lens.reshape(B, 1).astype(jnp.int32)

    kernel = _make_decoder_kernel(num_layers, T, B, H)
    n_in = 1 + len(weights) + 1

    out_tm = pl.pallas_call(
        kernel,
        out_shape=jax.ShapeDtypeStruct((T, B, H), x.dtype),
        in_specs=[pl.BlockSpec(memory_space=pltpu.MemorySpace.VMEM)] * n_in,
        out_specs=pl.BlockSpec(memory_space=pltpu.MemorySpace.VMEM),
        scratch_shapes=[
            pltpu.VMEM((T, B, H), jnp.float32),       # inter-layer sequence
            pltpu.VMEM((T, B, 4 * H), jnp.float32),   # precomputed input projections
        ],
    )(x_tm, *weights, lens2d)

    return jnp.transpose(out_tm, (1, 0, 2))           # batch-first (B, T, H)


# ----------------------------------------------------------------------------
# DecoderRNN: parameter setup + forward (hot path entirely inside one kernel).
# ----------------------------------------------------------------------------
class DecoderRNN:
    def __init__(self, hidden_size, output_size, num_layers, seq_len, key):
        self.hidden_size = hidden_size
        self.output_size = output_size
        self.num_layers = num_layers
        self.seq_len = seq_len

        H = output_size
        k = 1.0 / math.sqrt(H)                        # PyTorch default LSTM init bound
        flat = []
        for layer in range(num_layers):
            din = hidden_size if layer == 0 else output_size
            key, k_ih, k_hh, k_bih, k_bhh = jax.random.split(key, 5)
            if layer == 0:
                # nn.init.xavier_uniform_(w, gain=sqrt(2)) on (4H, din) / (4H, H)
                gain = math.sqrt(2.0)
                b_ih_w = gain * math.sqrt(6.0 / (din + 4 * H))
                b_hh_w = gain * math.sqrt(6.0 / (H + 4 * H))
                w_ih = jax.random.uniform(k_ih, (4 * H, din), jnp.float32, -b_ih_w, b_ih_w)
                w_hh = jax.random.uniform(k_hh, (4 * H, H), jnp.float32, -b_hh_w, b_hh_w)
            else:
                w_ih = jax.random.uniform(k_ih, (4 * H, din), jnp.float32, -k, k)
                w_hh = jax.random.uniform(k_hh, (4 * H, H), jnp.float32, -k, k)
            b_ih = jax.random.uniform(k_bih, (4 * H,), jnp.float32, -k, k)
            b_hh = jax.random.uniform(k_bhh, (4 * H,), jnp.float32, -k, k)
            flat.extend([
                jnp.transpose(w_ih),                  # W_ih^T : (din, 4H)
                jnp.transpose(w_hh),                  # W_hh^T : (H, 4H)
                (b_ih + b_hh).reshape(1, 4 * H),      # fused bias : (1, 4H)
            ])
        self.weights = tuple(flat)

    def __call__(self, encoded_input, lens=None):
        B, T, _ = encoded_input.shape
        assert T == self.seq_len
        if lens is None:
            lens = jnp.full((B,), T, dtype=jnp.int32)
        return _decoder_forward(encoded_input, lens, self.weights,
                                num_layers=self.num_layers,
                                output_size=self.output_size)


# ----------------------------------------------------------------------------
# Pure-JAX reference (lax.scan LSTM) for correctness checking.
# ----------------------------------------------------------------------------
def _reference_forward(x, lens, weights, num_layers, H):
    B, T, _ = x.shape
    seq = jnp.transpose(x, (1, 0, 2))                 # (T, B, Din)
    for layer in range(num_layers):
        w_ih, w_hh, b = weights[3 * layer], weights[3 * layer + 1], weights[3 * layer + 2]

        def step(carry, x_t):
            h, c = carry
            g = jnp.dot(x_t, w_ih) + jnp.dot(h, w_hh) + b
            i = jax.nn.sigmoid(g[:, 0 * H:1 * H])
            f = jax.nn.sigmoid(g[:, 1 * H:2 * H])
            gg = jnp.tanh(g[:, 2 * H:3 * H])
            o = jax.nn.sigmoid(g[:, 3 * H:4 * H])
            c = f * c + i * gg
            h = o * jnp.tanh(c)
            return (h, c), h

        init = (jnp.zeros((B, H), jnp.float32), jnp.zeros((B, H), jnp.float32))
        _, seq = lax.scan(step, init, seq)
    out = jnp.transpose(seq, (1, 0, 2))
    mask = (jnp.arange(T)[None, :] < lens[:, None])[..., None]
    return jnp.where(mask, out, 0.0)


if __name__ == "__main__":
    hidden_size = 32     # LSTM input size
    output_size = 32     # LSTM hidden size
    num_layers = 2
    seq_len = 8
    batch = 8

    key = jax.random.PRNGKey(0)
    key, k_model, k_x = jax.random.split(key, 3)

    model = DecoderRNN(hidden_size, output_size, num_layers, seq_len, k_model)

    x = jax.random.normal(k_x, (batch, seq_len, hidden_size), jnp.float32)
    lens = jnp.full((batch,), seq_len, dtype=jnp.int32)      # fully-packed sequences

    out = model(x, lens)
    out = jax.block_until_ready(out)
    assert out.shape == (batch, seq_len, output_size), out.shape
    assert bool(jnp.all(jnp.isfinite(out)))

    ref = _reference_forward(x, lens, model.weights, num_layers, output_size)
    ref = jax.block_until_ready(ref)
    assert jnp.allclose(out, ref, rtol=2e-3, atol=2e-3), float(jnp.max(jnp.abs(out - ref)))

    print("KERNEL_OK")
</pallas_src>

<mosaic_0001>
module attributes {stable_mosaic.version = 11 : i64} {
  func.func @kernel(%arg0: memref<8x8x32xf32, #tpu.memory_space<vmem>>, %arg1: memref<32x128xf32, #tpu.memory_space<vmem>>, %arg2: memref<32x128xf32, #tpu.memory_space<vmem>>, %arg3: memref<1x128xf32, #tpu.memory_space<vmem>>, %arg4: memref<32x128xf32, #tpu.memory_space<vmem>>, %arg5: memref<32x128xf32, #tpu.memory_space<vmem>>, %arg6: memref<1x128xf32, #tpu.memory_space<vmem>>, %arg7: memref<8x1xi32, #tpu.memory_space<vmem>>, %arg8: memref<8x8x32xf32, #tpu.memory_space<vmem>>, %arg9: memref<8x8x32xf32, #tpu.memory_space<vmem>>, %arg10: memref<8x8x128xf32, #tpu.memory_space<vmem>>) attributes {dimension_semantics = [], scalar_prefetch = 0 : i64, scratch_operands = 2 : i64, tpu.core_type = #tpu.core_type<tc>} {
    %c0 = arith.constant 0 : index
    %c0_0 = arith.constant 0 : index
    %0 = vector.load %arg7[%c0, %c0_0] : memref<8x1xi32, #tpu.memory_space<vmem>>, vector<8x1xi32>
    %c0_1 = arith.constant 0 : index
    %c0_2 = arith.constant 0 : index
    %1 = vector.load %arg1[%c0_1, %c0_2] : memref<32x128xf32, #tpu.memory_space<vmem>>, vector<32x128xf32>
    %c0_3 = arith.constant 0 : index
    %c0_4 = arith.constant 0 : index
    %2 = vector.load %arg2[%c0_3, %c0_4] : memref<32x128xf32, #tpu.memory_space<vmem>>, vector<32x128xf32>
    %c0_5 = arith.constant 0 : index
    %c0_6 = arith.constant 0 : index
    %3 = vector.load %arg3[%c0_5, %c0_6] : memref<1x128xf32, #tpu.memory_space<vmem>>, vector<1x128xf32>
    %c0_7 = arith.constant 0 : index
    %c0_8 = arith.constant 0 : index
    %c0_9 = arith.constant 0 : index
    %4 = vector.load %arg0[%c0_7, %c0_8, %c0_9] : memref<8x8x32xf32, #tpu.memory_space<vmem>>, vector<8x8x32xf32>
    %5 = vector.shape_cast %4 : vector<8x8x32xf32> to vector<64x32xf32>
    %cst = arith.constant dense<0.000000e+00> : vector<64x128xf32>
    %6 = tpu.matmul %5, %1, %cst {dimension_numbers = #tpu.dot_dimension_numbers<[1], [0], [0], [1], [0, 0, 1, 1], [], []>} : vector<64x32xf32>, vector<32x128xf32>, vector<64x128xf32> -> vector<64x128xf32>
    %7 = vector.broadcast %3 : vector<1x128xf32> to vector<64x128xf32>
    %8 = arith.addf %6, %7 : vector<64x128xf32>
    %9 = vector.shape_cast %8 : vector<64x128xf32> to vector<8x8x128xf32>
    %c0_10 = arith.constant 0 : index
    %c0_11 = arith.constant 0 : index
    %c0_12 = arith.constant 0 : index
    %10 = vector.load %arg10[%c0_10, %c0_11, %c0_12] : memref<8x8x128xf32, #tpu.memory_space<vmem>>, vector<8x8x128xf32>
    tpu.vector_store %arg10[%c0_10, %c0_11, %c0_12], %9 {strides = array<i32>} : memref<8x8x128xf32, #tpu.memory_space<vmem>>, vector<8x8x128xf32>,
    %cst_13 = arith.constant 0.000000e+00 : f32
    %11 = vector.broadcast %cst_13 : f32 to vector<8x32xf32>
    %cst_14 = arith.constant 0.000000e+00 : f32
    %12 = vector.broadcast %cst_14 : f32 to vector<8x32xf32>
    %c0_i32 = arith.constant 0 : i32
    %13 = arith.index_cast %c0_i32 : i32 to index
    %c0_15 = arith.constant 0 : index
    %c0_16 = arith.constant 0 : index
    %14 = vector.load %arg10[%13, %c0_15, %c0_16] : memref<8x8x128xf32, #tpu.memory_space<vmem>>, vector<1x8x128xf32>
    %15 = vector.shape_cast %14 : vector<1x8x128xf32> to vector<8x128xf32>
    %cst_17 = arith.constant dense<0.000000e+00> : vector<8x128xf32>
    %16 = tpu.matmul %11, %2, %cst_17 {dimension_numbers = #tpu.dot_dimension_numbers<[1], [0], [0], [1], [0, 0, 1, 1], [], []>} : vector<8x32xf32>, vector<32x128xf32>, vector<8x128xf32> -> vector<8x128xf32>
    %17 = arith.addf %15, %16 : vector<8x128xf32>
    %18 = arith.negf %17 : vector<8x128xf32>
    %19 = math.exp %18 : vector<8x128xf32>
    %cst_18 = arith.constant 1.000000e+00 : f32
    %20 = vector.broadcast %cst_18 : f32 to vector<8x128xf32>
    %21 = arith.addf %20, %19 : vector<8x128xf32>
    %22 = arith.divf %20, %21 : vector<8x128xf32>
    %23 = math.tanh %17 : vector<8x128xf32>
    %24 = vector.extract_strided_slice %22 {offsets = [0, 0], sizes = [8, 32], strides = [1, 1]} : vector<8x128xf32> to vector<8x32xf32>
    %25 = vector.extract_strided_slice %22 {offsets = [0, 32], sizes = [8, 32], strides = [1, 1]} : vector<8x128xf32> to vector<8x32xf32>
    %26 = vector.extract_strided_slice %23 {offsets = [0, 64], sizes = [8, 32], strides = [1, 1]} : vector<8x128xf32> to vector<8x32xf32>
    %27 = vector.extract_strided_slice %22 {offsets = [0, 96], sizes = [8, 32], strides = [1, 1]} : vector<8x128xf32> to vector<8x32xf32>
    %28 = arith.mulf %25, %12 : vector<8x32xf32>
    %29 = arith.mulf %24, %26 : vector<8x32xf32>
    %30 = arith.addf %28, %29 : vector<8x32xf32>
    %31 = math.tanh %30 : vector<8x32xf32>
    %32 = arith.mulf %27, %31 : vector<8x32xf32>
    %33 = arith.index_cast %c0_i32 : i32 to index
    %c0_19 = arith.constant 0 : index
    %c0_20 = arith.constant 0 : index
    %34 = vector.load %arg9[%33, %c0_19, %c0_20] : memref<8x8x32xf32, #tpu.memory_space<vmem>>, vector<1x8x32xf32>
    %35 = vector.shape_cast %34 : vector<1x8x32xf32> to vector<8x32xf32>
    %36 = vector.shape_cast %32 : vector<8x32xf32> to vector<1x8x32xf32>
    tpu.vector_store %arg9[%33, %c0_19, %c0_20], %36 {strides = array<i32>} : memref<8x8x32xf32, #tpu.memory_space<vmem>>, vector<1x8x32xf32>,
    %c1_i32 = arith.constant 1 : i32
    %37 = arith.index_cast %c1_i32 : i32 to index
    %c0_21 = arith.constant 0 : index
    %c0_22 = arith.constant 0 : index
    %38 = vector.load %arg10[%37, %c0_21, %c0_22] : memref<8x8x128xf32, #tpu.memory_space<vmem>>, vector<1x8x128xf32>
    %39 = vector.shape_cast %38 : vector<1x8x128xf32> to vector<8x128xf32>
    %cst_23 = arith.constant dense<0.000000e+00> : vector<8x128xf32>
    %40 = tpu.matmul %32, %2, %cst_23 {dimension_numbers = #tpu.dot_dimension_numbers<[1], [0], [0], [1], [0, 0, 1, 1], [], []>} : vector<8x32xf32>, vector<32x128xf32>, vector<8x128xf32> -> vector<8x128xf32>
    %41 = arith.addf %39, %40 : vector<8x128xf32>
    %42 = arith.negf %41 : vector<8x128xf32>
    %43 = math.exp %42 : vector<8x128xf32>
    %cst_24 = arith.constant 1.000000e+00 : f32
    %44 = vector.broadcast %cst_24 : f32 to vector<8x128xf32>
    %45 = arith.addf %44, %43 : vector<8x128xf32>
    %46 = arith.divf %44, %45 : vector<8x128xf32>
    %47 = math.tanh %41 : vector<8x128xf32>
    %48 = vector.extract_strided_slice %46 {offsets = [0, 0], sizes = [8, 32], strides = [1, 1]} : vector<8x128xf32> to vector<8x32xf32>
    %49 = vector.extract_strided_slice %46 {offsets = [0, 32], sizes = [8, 32], strides = [1, 1]} : vector<8x128xf32> to vector<8x32xf32>
    %50 = vector.extract_strided_slice %47 {offsets = [0, 64], sizes = [8, 32], strides = [1, 1]} : vector<8x128xf32> to vector<8x32xf32>
    %51 = vector.extract_strided_slice %46 {offsets = [0, 96], sizes = [8, 32], strides = [1, 1]} : vector<8x128xf32> to vector<8x32xf32>
    %52 = arith.mulf %49, %30 : vector<8x32xf32>
    %53 = arith.mulf %48, %50 : vector<8x32xf32>
    %54 = arith.addf %52, %53 : vector<8x32xf32>
    %55 = math.tanh %54 : vector<8x32xf32>
    %56 = arith.mulf %51, %55 : vector<8x32xf32>
    %57 = arith.index_cast %c1_i32 : i32 to index
    %c0_25 = arith.constant 0 : index
    %c0_26 = arith.constant 0 : index
    %58 = vector.load %arg9[%57, %c0_25, %c0_26] : memref<8x8x32xf32, #tpu.memory_space<vmem>>, vector<1x8x32xf32>
    %59 = vector.shape_cast %58 : vector<1x8x32xf32> to vector<8x32xf32>
    %60 = vector.shape_cast %56 : vector<8x32xf32> to vector<1x8x32xf32>
    tpu.vector_store %arg9[%57, %c0_25, %c0_26], %60 {strides = array<i32>} : memref<8x8x32xf32, #tpu.memory_space<vmem>>, vector<1x8x32xf32>,
    %c2_i32 = arith.constant 2 : i32
    %61 = arith.index_cast %c2_i32 : i32 to index
    %c0_27 = arith.constant 0 : index
    %c0_28 = arith.constant 0 : index
    %62 = vector.load %arg10[%61, %c0_27, %c0_28] : memref<8x8x128xf32, #tpu.memory_space<vmem>>, vector<1x8x128xf32>
    %63 = vector.shape_cast %62 : vector<1x8x128xf32> to vector<8x128xf32>
    %cst_29 = arith.constant dense<0.000000e+00> : vector<8x128xf32>
    %64 = tpu.matmul %56, %2, %cst_29 {dimension_numbers = #tpu.dot_dimension_numbers<[1], [0], [0], [1], [0, 0, 1, 1], [], []>} : vector<8x32xf32>, vector<32x128xf32>, vector<8x128xf32> -> vector<8x128xf32>
    %65 = arith.addf %63, %64 : vector<8x128xf32>
    %66 = arith.negf %65 : vector<8x128xf32>
    %67 = math.exp %66 : vector<8x128xf32>
    %cst_30 = arith.constant 1.000000e+00 : f32
    %68 = vector.broadcast %cst_30 : f32 to vector<8x128xf32>
    %69 = arith.addf %68, %67 : vector<8x128xf32>
    %70 = arith.divf %68, %69 : vector<8x128xf32>
    %71 = math.tanh %65 : vector<8x128xf32>
    %72 = vector.extract_strided_slice %70 {offsets = [0, 0], sizes = [8, 32], strides = [1, 1]} : vector<8x128xf32> to vector<8x32xf32>
    %73 = vector.extract_strided_slice %70 {offsets = [0, 32], sizes = [8, 32], strides = [1, 1]} : vector<8x128xf32> to vector<8x32xf32>
    %74 = vector.extract_strided_slice %71 {offsets = [0, 64], sizes = [8, 32], strides = [1, 1]} : vector<8x128xf32> to vector<8x32xf32>
    %75 = vector.extract_strided_slice %70 {offsets = [0, 96], sizes = [8, 32], strides = [1, 1]} : vector<8x128xf32> to vector<8x32xf32>
    %76 = arith.mulf %73, %54 : vector<8x32xf32>
    %77 = arith.mulf %72, %74 : vector<8x32xf32>
    %78 = arith.addf %76, %77 : vector<8x32xf32>
    %79 = math.tanh %78 : vector<8x32xf32>
    %80 = arith.mulf %75, %79 : vector<8x32xf32>
    %81 = arith.index_cast %c2_i32 : i32 to index
    %c0_31 = arith.constant 0 : index
    %c0_32 = arith.constant 0 : index
    %82 = vector.load %arg9[%81, %c0_31, %c0_32] : memref<8x8x32xf32, #tpu.memory_space<vmem>>, vector<1x8x32xf32>
    %83 = vector.shape_cast %82 : vector<1x8x32xf32> to vector<8x32xf32>
    %84 = vector.shape_cast %80 : vector<8x32xf32> to vector<1x8x32xf32>
    tpu.vector_store %arg9[%81, %c0_31, %c0_32], %84 {strides = array<i32>} : memref<8x8x32xf32, #tpu.memory_space<vmem>>, vector<1x8x32xf32>,
    %c3_i32 = arith.constant 3 : i32
    %85 = arith.index_cast %c3_i32 : i32 to index
    %c0_33 = arith.constant 0 : index
    %c0_34 = arith.constant 0 : index
    %86 = vector.load %arg10[%85, %c0_33, %c0_34] : memref<8x8x128xf32, #tpu.memory_space<vmem>>, vector<1x8x128xf32>
    %87 = vector.shape_cast %86 : vector<1x8x128xf32> to vector<8x128xf32>
    %cst_35 = arith.constant dense<0.000000e+00> : vector<8x128xf32>
    %88 = tpu.matmul %80, %2, %cst_35 {dimension_numbers = #tpu.dot_dimension_numbers<[1], [0], [0], [1], [0, 0, 1, 1], [], []>} : vector<8x32xf32>, vector<32x128xf32>, vector<8x128xf32> -> vector<8x128xf32>
    %89 = arith.addf %87, %88 : vector<8x128xf32>
    %90 = arith.negf %89 : vector<8x128xf32>
    %91 = math.exp %90 : vector<8x128xf32>
    %cst_36 = arith.constant 1.000000e+00 : f32
    %92 = vector.broadcast %cst_36 : f32 to vector<8x128xf32>
    %93 = arith.addf %92, %91 : vector<8x128xf32>
    %94 = arith.divf %92, %93 : vector<8x128xf32>
    %95 = math.tanh %89 : vector<8x128xf32>
    %96 = vector.extract_strided_slice %94 {offsets = [0, 0], sizes = [8, 32], strides = [1, 1]} : vector<8x128xf32> to vector<8x32xf32>
    %97 = vector.extract_strided_slice %94 {offsets = [0, 32], sizes = [8, 32], strides = [1, 1]} : vector<8x128xf32> to vector<8x32xf32>
    %98 = vector.extract_strided_slice %95 {offsets = [0, 64], sizes = [8, 32], strides = [1, 1]} : vector<8x128xf32> to vector<8x32xf32>
    %99 = vector.extract_strided_slice %94 {offsets = [0, 96], sizes = [8, 32], strides = [1, 1]} : vector<8x128xf32> to vector<8x32xf32>
    %100 = arith.mulf %97, %78 : vector<8x32xf32>
    %101 = arith.mulf %96, %98 : vector<8x32xf32>
    %102 = arith.addf %100, %101 : vector<8x32xf32>
    %103 = math.tanh %102 : vector<8x32xf32>
    %104 = arith.mulf %99, %103 : vector<8x32xf32>
    %105 = arith.index_cast %c3_i32 : i32 to index
    %c0_37 = arith.constant 0 : index
    %c0_38 = arith.constant 0 : index
    %106 = vector.load %arg9[%105, %c0_37, %c0_38] : memref<8x8x32xf32, #tpu.memory_space<vmem>>, vector<1x8x32xf32>
    %107 = vector.shape_cast %106 : vector<1x8x32xf32> to vector<8x32xf32>
    %108 = vector.shape_cast %104 : vector<8x32xf32> to vector<1x8x32xf32>
    tpu.vector_store %arg9[%105, %c0_37, %c0_38], %108 {strides = array<i32>} : memref<8x8x32xf32, #tpu.memory_space<vmem>>, vector<1x8x32xf32>,
    %c4_i32 = arith.constant 4 : i32
    %109 = arith.index_cast %c4_i32 : i32 to index
    %c0_39 = arith.constant 0 : index
    %c0_40 = arith.constant 0 : index
    %110 = vector.load %arg10[%109, %c0_39, %c0_40] : memref<8x8x128xf32, #tpu.memory_space<vmem>>, vector<1x8x128xf32>
    %111 = vector.shape_cast %110 : vector<1x8x128xf32> to vector<8x128xf32>
    %cst_41 = arith.constant dense<0.000000e+00> : vector<8x128xf32>
    %112 = tpu.matmul %104, %2, %cst_41 {dimension_numbers = #tpu.dot_dimension_numbers<[1], [0], [0], [1], [0, 0, 1, 1], [], []>} : vector<8x32xf32>, vector<32x128xf32>, vector<8x128xf32> -> vector<8x128xf32>
    %113 = arith.addf %111, %112 : vector<8x128xf32>
    %114 = arith.negf %113 : vector<8x128xf32>
    %115 = math.exp %114 : vector<8x128xf32>
    %cst_42 = arith.constant 1.000000e+00 : f32
    %116 = vector.broadcast %cst_42 : f32 to vector<8x128xf32>
    %117 = arith.addf %116, %115 : vector<8x128xf32>
    %118 = arith.divf %116, %117 : vector<8x128xf32>
    %119 = math.tanh %113 : vector<8x128xf32>
    %120 = vector.extract_strided_slice %118 {offsets = [0, 0], sizes = [8, 32], strides = [1, 1]} : vector<8x128xf32> to vector<8x32xf32>
    %121 = vector.extract_strided_slice %118 {offsets = [0, 32], sizes = [8, 32], strides = [1, 1]} : vector<8x128xf32> to vector<8x32xf32>
    %122 = vector.extract_strided_slice %119 {offsets = [0, 64], sizes = [8, 32], strides = [1, 1]} : vector<8x128xf32> to vector<8x32xf32>
    %123 = vector.extract_strided_slice %118 {offsets = [0, 96], sizes = [8, 32], strides = [1, 1]} : vector<8x128xf32> to vector<8x32xf32>
    %124 = arith.mulf %121, %102 : vector<8x32xf32>
    %125 = arith.mulf %120, %122 : vector<8x32xf32>
    %126 = arith.addf %124, %125 : vector<8x32xf32>
    %127 = math.tanh %126 : vector<8x32xf32>
    %128 = arith.mulf %123, %127 : vector<8x32xf32>
    %129 = arith.index_cast %c4_i32 : i32 to index
    %c0_43 = arith.constant 0 : index
    %c0_44 = arith.constant 0 : index
    %130 = vector.load %arg9[%129, %c0_43, %c0_44] : memref<8x8x32xf32, #tpu.memory_space<vmem>>, vector<1x8x32xf32>
    %131 = vector.shape_cast %130 : vector<1x8x32xf32> to vector<8x32xf32>
    %132 = vector.shape_cast %128 : vector<8x32xf32> to vector<1x8x32xf32>
    tpu.vector_store %arg9[%129, %c0_43, %c0_44], %132 {strides = array<i32>} : memref<8x8x32xf32, #tpu.memory_space<vmem>>, vector<1x8x32xf32>,
    %c5_i32 = arith.constant 5 : i32
    %133 = arith.index_cast %c5_i32 : i32 to index
    %c0_45 = arith.constant 0 : index
    %c0_46 = arith.constant 0 : index
    %134 = vector.load %arg10[%133, %c0_45, %c0_46] : memref<8x8x128xf32, #tpu.memory_space<vmem>>, vector<1x8x128xf32>
    %135 = vector.shape_cast %134 : vector<1x8x128xf32> to vector<8x128xf32>
    %cst_47 = arith.constant dense<0.000000e+00> : vector<8x128xf32>
    %136 = tpu.matmul %128, %2, %cst_47 {dimension_numbers = #tpu.dot_dimension_numbers<[1], [0], [0], [1], [0, 0, 1, 1], [], []>} : vector<8x32xf32>, vector<32x128xf32>, vector<8x128xf32> -> vector<8x128xf32>
    %137 = arith.addf %135, %136 : vector<8x128xf32>
    %138 = arith.negf %137 : vector<8x128xf32>
    %139 = math.exp %138 : vector<8x128xf32>
    %cst_48 = arith.constant 1.000000e+00 : f32
    %140 = vector.broadcast %cst_48 : f32 to vector<8x128xf32>
    %141 = arith.addf %140, %139 : vector<8x128xf32>
    %142 = arith.divf %140, %141 : vector<8x128xf32>
    %143 = math.tanh %137 : vector<8x128xf32>
    %144 = vector.extract_strided_slice %142 {offsets = [0, 0], sizes = [8, 32], strides = [1, 1]} : vector<8x128xf32> to vector<8x32xf32>
    %145 = vector.extract_strided_slice %142 {offsets = [0, 32], sizes = [8, 32], strides = [1, 1]} : vector<8x128xf32> to vector<8x32xf32>
    %146 = vector.extract_strided_slice %143 {offsets = [0, 64], sizes = [8, 32], strides = [1, 1]} : vector<8x128xf32> to vector<8x32xf32>
    %147 = vector.extract_strided_slice %142 {offsets = [0, 96], sizes = [8, 32], strides = [1, 1]} : vector<8x128xf32> to vector<8x32xf32>
    %148 = arith.mulf %145, %126 : vector<8x32xf32>
    %149 = arith.mulf %144, %146 : vector<8x32xf32>
    %150 = arith.addf %148, %149 : vector<8x32xf32>
    %151 = math.tanh %150 : vector<8x32xf32>
    %152 = arith.mulf %147, %151 : vector<8x32xf32>
    %153 = arith.index_cast %c5_i32 : i32 to index
    %c0_49 = arith.constant 0 : index
    %c0_50 = arith.constant 0 : index
    %154 = vector.load %arg9[%153, %c0_49, %c0_50] : memref<8x8x32xf32, #tpu.memory_space<vmem>>, vector<1x8x32xf32>
    %155 = vector.shape_cast %154 : vector<1x8x32xf32> to vector<8x32xf32>
    %156 = vector.shape_cast %152 : vector<8x32xf32> to vector<1x8x32xf32>
    tpu.vector_store %arg9[%153, %c0_49, %c0_50], %156 {strides = array<i32>} : memref<8x8x32xf32, #tpu.memory_space<vmem>>, vector<1x8x32xf32>,
    %c6_i32 = arith.constant 6 : i32
    %157 = arith.index_cast %c6_i32 : i32 to index
    %c0_51 = arith.constant 0 : index
    %c0_52 = arith.constant 0 : index
    %158 = vector.load %arg10[%157, %c0_51, %c0_52] : memref<8x8x128xf32, #tpu.memory_space<vmem>>, vector<1x8x128xf32>
    %159 = vector.shape_cast %158 : vector<1x8x128xf32> to vector<8x128xf32>
    %cst_53 = arith.constant dense<0.000000e+00> : vector<8x128xf32>
    %160 = tpu.matmul %152, %2, %cst_53 {dimension_numbers = #tpu.dot_dimension_numbers<[1], [0], [0], [1], [0, 0, 1, 1], [], []>} : vector<8x32xf32>, vector<32x128xf32>, vector<8x128xf32> -> vector<8x128xf32>
    %161 = arith.addf %159, %160 : vector<8x128xf32>
    %162 = arith.negf %161 : vector<8x128xf32>
    %163 = math.exp %162 : vector<8x128xf32>
    %cst_54 = arith.constant 1.000000e+00 : f32
    %164 = vector.broadcast %cst_54 : f32 to vector<8x128xf32>
    %165 = arith.addf %164, %163 : vector<8x128xf32>
    %166 = arith.divf %164, %165 : vector<8x128xf32>
    %167 = math.tanh %161 : vector<8x128xf32>
    %168 = vector.extract_strided_slice %166 {offsets = [0, 0], sizes = [8, 32], strides = [1, 1]} : vector<8x128xf32> to vector<8x32xf32>
    %169 = vector.extract_strided_slice %166 {offsets = [0, 32], sizes = [8, 32], strides = [1, 1]} : vector<8x128xf32> to vector<8x32xf32>
    %170 = vector.extract_strided_slice %167 {offsets = [0, 64], sizes = [8, 32], strides = [1, 1]} : vector<8x128xf32> to vector<8x32xf32>
    %171 = vector.extract_strided_slice %166 {offsets = [0, 96], sizes = [8, 32], strides = [1, 1]} : vector<8x128xf32> to vector<8x32xf32>
    %172 = arith.mulf %169, %150 : vector<8x32xf32>
    %173 = arith.mulf %168, %170 : vector<8x32xf32>
    %174 = arith.addf %172, %173 : vector<8x32xf32>
    %175 = math.tanh %174 : vector<8x32xf32>
    %176 = arith.mulf %171, %175 : vector<8x32xf32>
    %177 = arith.index_cast %c6_i32 : i32 to index
    %c0_55 = arith.constant 0 : index
    %c0_56 = arith.constant 0 : index
    %178 = vector.load %arg9[%177, %c0_55, %c0_56] : memref<8x8x32xf32, #tpu.memory_space<vmem>>, vector<1x8x32xf32>
    %179 = vector.shape_cast %178 : vector<1x8x32xf32> to vector<8x32xf32>
    %180 = vector.shape_cast %176 : vector<8x32xf32> to vector<1x8x32xf32>
    tpu.vector_store %arg9[%177, %c0_55, %c0_56], %180 {strides = array<i32>} : memref<8x8x32xf32, #tpu.memory_space<vmem>>, vector<1x8x32xf32>,
    %c7_i32 = arith.constant 7 : i32
    %181 = arith.index_cast %c7_i32 : i32 to index
    %c0_57 = arith.constant 0 : index
    %c0_58 = arith.constant 0 : index
    %182 = vector.load %arg10[%181, %c0_57, %c0_58] : memref<8x8x128xf32, #tpu.memory_space<vmem>>, vector<1x8x128xf32>
    %183 = vector.shape_cast %182 : vector<1x8x128xf32> to vector<8x128xf32>
    %cst_59 = arith.constant dense<0.000000e+00> : vector<8x128xf32>
    %184 = tpu.matmul %176, %2, %cst_59 {dimension_numbers = #tpu.dot_dimension_numbers<[1], [0], [0], [1], [0, 0, 1, 1], [], []>} : vector<8x32xf32>, vector<32x128xf32>, vector<8x128xf32> -> vector<8x128xf32>
    %185 = arith.addf %183, %184 : vector<8x128xf32>
    %186 = arith.negf %185 : vector<8x128xf32>
    %187 = math.exp %186 : vector<8x128xf32>
    %cst_60 = arith.constant 1.000000e+00 : f32
    %188 = vector.broadcast %cst_60 : f32 to vector<8x128xf32>
    %189 = arith.addf %188, %187 : vector<8x128xf32>
    %190 = arith.divf %188, %189 : vector<8x128xf32>
    %191 = math.tanh %185 : vector<8x128xf32>
    %192 = vector.extract_strided_slice %190 {offsets = [0, 0], sizes = [8, 32], strides = [1, 1]} : vector<8x128xf32> to vector<8x32xf32>
    %193 = vector.extract_strided_slice %190 {offsets = [0, 32], sizes = [8, 32], strides = [1, 1]} : vector<8x128xf32> to vector<8x32xf32>
    %194 = vector.extract_strided_slice %191 {offsets = [0, 64], sizes = [8, 32], strides = [1, 1]} : vector<8x128xf32> to vector<8x32xf32>
    %195 = vector.extract_strided_slice %190 {offsets = [0, 96], sizes = [8, 32], strides = [1, 1]} : vector<8x128xf32> to vector<8x32xf32>
    %196 = arith.mulf %193, %174 : vector<8x32xf32>
    %197 = arith.mulf %192, %194 : vector<8x32xf32>
    %198 = arith.addf %196, %197 : vector<8x32xf32>
    %199 = math.tanh %198 : vector<8x32xf32>
    %200 = arith.mulf %195, %199 : vector<8x32xf32>
    %201 = arith.index_cast %c7_i32 : i32 to index
    %c0_61 = arith.constant 0 : index
    %c0_62 = arith.constant 0 : index
    %202 = vector.load %arg9[%201, %c0_61, %c0_62] : memref<8x8x32xf32, #tpu.memory_space<vmem>>, vector<1x8x32xf32>
    %203 = vector.shape_cast %202 : vector<1x8x32xf32> to vector<8x32xf32>
    %204 = vector.shape_cast %200 : vector<8x32xf32> to vector<1x8x32xf32>
    tpu.vector_store %arg9[%201, %c0_61, %c0_62], %204 {strides = array<i32>} : memref<8x8x32xf32, #tpu.memory_space<vmem>>, vector<1x8x32xf32>,
    %c8_i32 = arith.constant 8 : i32
    %c0_63 = arith.constant 0 : index
    %c0_64 = arith.constant 0 : index
    %205 = vector.load %arg4[%c0_63, %c0_64] : memref<32x128xf32, #tpu.memory_space<vmem>>, vector<32x128xf32>
    %c0_65 = arith.constant 0 : index
    %c0_66 = arith.constant 0 : index
    %206 = vector.load %arg5[%c0_65, %c0_66] : memref<32x128xf32, #tpu.memory_space<vmem>>, vector<32x128xf32>
    %c0_67 = arith.constant 0 : index
    %c0_68 = arith.constant 0 : index
    %207 = vector.load %arg6[%c0_67, %c0_68] : memref<1x128xf32, #tpu.memory_space<vmem>>, vector<1x128xf32>
    %c0_69 = arith.constant 0 : index
    %c0_70 = arith.constant 0 : index
    %c0_71 = arith.constant 0 : index
    %208 = vector.load %arg9[%c0_69, %c0_70, %c0_71] : memref<8x8x32xf32, #tpu.memory_space<vmem>>, vector<8x8x32xf32>
    %209 = vector.shape_cast %208 : vector<8x8x32xf32> to vector<64x32xf32>
    %cst_72 = arith.constant dense<0.000000e+00> : vector<64x128xf32>
    %210 = tpu.matmul %209, %205, %cst_72 {dimension_numbers = #tpu.dot_dimension_numbers<[1], [0], [0], [1], [0, 0, 1, 1], [], []>} : vector<64x32xf32>, vector<32x128xf32>, vector<64x128xf32> -> vector<64x128xf32>
    %211 = vector.broadcast %207 : vector<1x128xf32> to vector<64x128xf32>
    %212 = arith.addf %210, %211 : vector<64x128xf32>
    %213 = vector.shape_cast %212 : vector<64x128xf32> to vector<8x8x128xf32>
    %c0_73 = arith.constant 0 : index
    %c0_74 = arith.constant 0 : index
    %c0_75 = arith.constant 0 : index
    %214 = vector.load %arg10[%c0_73, %c0_74, %c0_75] : memref<8x8x128xf32, #tpu.memory_space<vmem>>, vector<8x8x128xf32>
    tpu.vector_store %arg10[%c0_73, %c0_74, %c0_75], %213 {strides = array<i32>} : memref<8x8x128xf32, #tpu.memory_space<vmem>>, vector<8x8x128xf32>,
    %cst_76 = arith.constant 0.000000e+00 : f32
    %215 = vector.broadcast %cst_76 : f32 to vector<8x32xf32>
    %cst_77 = arith.constant 0.000000e+00 : f32
    %216 = vector.broadcast %cst_77 : f32 to vector<8x32xf32>
    %c0_i32_78 = arith.constant 0 : i32
    %217 = arith.index_cast %c0_i32_78 : i32 to index
    %c0_79 = arith.constant 0 : index
    %c0_80 = arith.constant 0 : index
    %218 = vector.load %arg10[%217, %c0_79, %c0_80] : memref<8x8x128xf32, #tpu.memory_space<vmem>>, vector<1x8x128xf32>
    %219 = vector.shape_cast %218 : vector<1x8x128xf32> to vector<8x128xf32>
    %cst_81 = arith.constant dense<0.000000e+00> : vector<8x128xf32>
    %220 = tpu.matmul %215, %206, %cst_81 {dimension_numbers = #tpu.dot_dimension_numbers<[1], [0], [0], [1], [0, 0, 1, 1], [], []>} : vector<8x32xf32>, vector<32x128xf32>, vector<8x128xf32> -> vector<8x128xf32>
    %221 = arith.addf %219, %220 : vector<8x128xf32>
    %222 = arith.negf %221 : vector<8x128xf32>
    %223 = math.exp %222 : vector<8x128xf32>
    %cst_82 = arith.constant 1.000000e+00 : f32
    %224 = vector.broadcast %cst_82 : f32 to vector<8x128xf32>
    %225 = arith.addf %224, %223 : vector<8x128xf32>
    %226 = arith.divf %224, %225 : vector<8x128xf32>
    %227 = math.tanh %221 : vector<8x128xf32>
    %228 = vector.extract_strided_slice %226 {offsets = [0, 0], sizes = [8, 32], strides = [1, 1]} : vector<8x128xf32> to vector<8x32xf32>
    %229 = vector.extract_strided_slice %226 {offsets = [0, 32], sizes = [8, 32], strides = [1, 1]} : vector<8x128xf32> to vector<8x32xf32>
    %230 = vector.extract_strided_slice %227 {offsets = [0, 64], sizes = [8, 32], strides = [1, 1]} : vector<8x128xf32> to vector<8x32xf32>
    %231 = vector.extract_strided_slice %226 {offsets = [0, 96], sizes = [8, 32], strides = [1, 1]} : vector<8x128xf32> to vector<8x32xf32>
    %232 = arith.mulf %229, %216 : vector<8x32xf32>
    %233 = arith.mulf %228, %230 : vector<8x32xf32>
    %234 = arith.addf %232, %233 : vector<8x32xf32>
    %235 = math.tanh %234 : vector<8x32xf32>
    %236 = arith.mulf %231, %235 : vector<8x32xf32>
    %237 = vector.broadcast %c0_i32_78 : i32 to vector<8x1xi32>
    %238 = arith.cmpi sgt, %0, %237 : vector<8x1xi32>
    %cst_83 = arith.constant 0.000000e+00 : f32
    %239 = vector.shape_cast %238 : vector<8x1xi1> to vector<8x1xi1>
    %240 = vector.broadcast %239 : vector<8x1xi1> to vector<8x32xi1>
    %241 = vector.broadcast %cst_83 : f32 to vector<8x32xf32>
    %242 = arith.select %240, %236, %241 : vector<8x32xi1>, vector<8x32xf32>
    %243 = arith.index_cast %c0_i32_78 : i32 to index
    %c0_84 = arith.constant 0 : index
    %c0_85 = arith.constant 0 : index
    %244 = vector.load %arg8[%243, %c0_84, %c0_85] : memref<8x8x32xf32, #tpu.memory_space<vmem>>, vector<1x8x32xf32>
    %245 = vector.shape_cast %244 : vector<1x8x32xf32> to vector<8x32xf32>
    %246 = vector.shape_cast %242 : vector<8x32xf32> to vector<1x8x32xf32>
    tpu.vector_store %arg8[%243, %c0_84, %c0_85], %246 {strides = array<i32>} : memref<8x8x32xf32, #tpu.memory_space<vmem>>, vector<1x8x32xf32>,
    %c1_i32_86 = arith.constant 1 : i32
    %247 = arith.index_cast %c1_i32_86 : i32 to index
    %c0_87 = arith.constant 0 : index
    %c0_88 = arith.constant 0 : index
    %248 = vector.load %arg10[%247, %c0_87, %c0_88] : memref<8x8x128xf32, #tpu.memory_space<vmem>>, vector<1x8x128xf32>
    %249 = vector.shape_cast %248 : vector<1x8x128xf32> to vector<8x128xf32>
    %cst_89 = arith.constant dense<0.000000e+00> : vector<8x128xf32>
    %250 = tpu.matmul %236, %206, %cst_89 {dimension_numbers = #tpu.dot_dimension_numbers<[1], [0], [0], [1], [0, 0, 1, 1], [], []>} : vector<8x32xf32>, vector<32x128xf32>, vector<8x128xf32> -> vector<8x128xf32>
    %251 = arith.addf %249, %250 : vector<8x128xf32>
    %252 = arith.negf %251 : vector<8x128xf32>
    %253 = math.exp %252 : vector<8x128xf32>
    %cst_90 = arith.constant 1.000000e+00 : f32
    %254 = vector.broadcast %cst_90 : f32 to vector<8x128xf32>
    %255 = arith.addf %254, %253 : vector<8x128xf32>
    %256 = arith.divf %254, %255 : vector<8x128xf32>
    %257 = math.tanh %251 : vector<8x128xf32>
    %258 = vector.extract_strided_slice %256 {offsets = [0, 0], sizes = [8, 32], strides = [1, 1]} : vector<8x128xf32> to vector<8x32xf32>
    %259 = vector.extract_strided_slice %256 {offsets = [0, 32], sizes = [8, 32], strides = [1, 1]} : vector<8x128xf32> to vector<8x32xf32>
    %260 = vector.extract_strided_slice %257 {offsets = [0, 64], sizes = [8, 32], strides = [1, 1]} : vector<8x128xf32> to vector<8x32xf32>
    %261 = vector.extract_strided_slice %256 {offsets = [0, 96], sizes = [8, 32], strides = [1, 1]} : vector<8x128xf32> to vector<8x32xf32>
    %262 = arith.mulf %259, %234 : vector<8x32xf32>
    %263 = arith.mulf %258, %260 : vector<8x32xf32>
    %264 = arith.addf %262, %263 : vector<8x32xf32>
    %265 = math.tanh %264 : vector<8x32xf32>
    %266 = arith.mulf %261, %265 : vector<8x32xf32>
    %267 = vector.broadcast %c1_i32_86 : i32 to vector<8x1xi32>
    %268 = arith.cmpi sgt, %0, %267 : vector<8x1xi32>
    %cst_91 = arith.constant 0.000000e+00 : f32
    %269 = vector.shape_cast %268 : vector<8x1xi1> to vector<8x1xi1>
    %270 = vector.broadcast %269 : vector<8x1xi1> to vector<8x32xi1>
    %271 = vector.broadcast %cst_91 : f32 to vector<8x32xf32>
    %272 = arith.select %270, %266, %271 : vector<8x32xi1>, vector<8x32xf32>
    %273 = arith.index_cast %c1_i32_86 : i32 to index
    %c0_92 = arith.constant 0 : index
    %c0_93 = arith.constant 0 : index
    %274 = vector.load %arg8[%273, %c0_92, %c0_93] : memref<8x8x32xf32, #tpu.memory_space<vmem>>, vector<1x8x32xf32>
    %275 = vector.shape_cast %274 : vector<1x8x32xf32> to vector<8x32xf32>
    %276 = vector.shape_cast %272 : vector<8x32xf32> to vector<1x8x32xf32>
    tpu.vector_store %arg8[%273, %c0_92, %c0_93], %276 {strides = array<i32>} : memref<8x8x32xf32, #tpu.memory_space<vmem>>, vector<1x8x32xf32>,
    %c2_i32_94 = arith.constant 2 : i32
    %277 = arith.index_cast %c2_i32_94 : i32 to index
    %c0_95 = arith.constant 0 : index
    %c0_96 = arith.constant 0 : index
    %278 = vector.load %arg10[%277, %c0_95, %c0_96] : memref<8x8x128xf32, #tpu.memory_space<vmem>>, vector<1x8x128xf32>
    %279 = vector.shape_cast %278 : vector<1x8x128xf32> to vector<8x128xf32>
    %cst_97 = arith.constant dense<0.000000e+00> : vector<8x128xf32>
    %280 = tpu.matmul %266, %206, %cst_97 {dimension_numbers = #tpu.dot_dimension_numbers<[1], [0], [0], [1], [0, 0, 1, 1], [], []>} : vector<8x32xf32>, vector<32x128xf32>, vector<8x128xf32> -> vector<8x128xf32>
    %281 = arith.addf %279, %280 : vector<8x128xf32>
    %282 = arith.negf %281 : vector<8x128xf32>
    %283 = math.exp %282 : vector<8x128xf32>
    %cst_98 = arith.constant 1.000000e+00 : f32
    %284 = vector.broadcast %cst_98 : f32 to vector<8x128xf32>
    %285 = arith.addf %284, %283 : vector<8x128xf32>
    %286 = arith.divf %284, %285 : vector<8x128xf32>
    %287 = math.tanh %281 : vector<8x128xf32>
    %288 = vector.extract_strided_slice %286 {offsets = [0, 0], sizes = [8, 32], strides = [1, 1]} : vector<8x128xf32> to vector<8x32xf32>
    %289 = vector.extract_strided_slice %286 {offsets = [0, 32], sizes = [8, 32], strides = [1, 1]} : vector<8x128xf32> to vector<8x32xf32>
    %290 = vector.extract_strided_slice %287 {offsets = [0, 64], sizes = [8, 32], strides = [1, 1]} : vector<8x128xf32> to vector<8x32xf32>
    %291 = vector.extract_strided_slice %286 {offsets = [0, 96], sizes = [8, 32], strides = [1, 1]} : vector<8x128xf32> to vector<8x32xf32>
    %292 = arith.mulf %289, %264 : vector<8x32xf32>
    %293 = arith.mulf %288, %290 : vector<8x32xf32>
    %294 = arith.addf %292, %293 : vector<8x32xf32>
    %295 = math.tanh %294 : vector<8x32xf32>
    %296 = arith.mulf %291, %295 : vector<8x32xf32>
    %297 = vector.broadcast %c2_i32_94 : i32 to vector<8x1xi32>
    %298 = arith.cmpi sgt, %0, %297 : vector<8x1xi32>
    %cst_99 = arith.constant 0.000000e+00 : f32
    %299 = vector.shape_cast %298 : vector<8x1xi1> to vector<8x1xi1>
    %300 = vector.broadcast %299 : vector<8x1xi1> to vector<8x32xi1>
    %301 = vector.broadcast %cst_99 : f32 to vector<8x32xf32>
    %302 = arith.select %300, %296, %301 : vector<8x32xi1>, vector<8x32xf32>
    %303 = arith.index_cast %c2_i32_94 : i32 to index
    %c0_100 = arith.constant 0 : index
    %c0_101 = arith.constant 0 : index
    %304 = vector.load %arg8[%303, %c0_100, %c0_101] : memref<8x8x32xf32, #tpu.memory_space<vmem>>, vector<1x8x32xf32>
    %305 = vector.shape_cast %304 : vector<1x8x32xf32> to vector<8x32xf32>
    %306 = vector.shape_cast %302 : vector<8x32xf32> to vector<1x8x32xf32>
    tpu.vector_store %arg8[%303, %c0_100, %c0_101], %306 {strides = array<i32>} : memref<8x8x32xf32, #tpu.memory_space<vmem>>, vector<1x8x32xf32>,
    %c3_i32_102 = arith.constant 3 : i32
    %307 = arith.index_cast %c3_i32_102 : i32 to index
    %c0_103 = arith.constant 0 : index
    %c0_104 = arith.constant 0 : index
    %308 = vector.load %arg10[%307, %c0_103, %c0_104] : memref<8x8x128xf32, #tpu.memory_space<vmem>>, vector<1x8x128xf32>
    %309 = vector.shape_cast %308 : vector<1x8x128xf32> to vector<8x128xf32>
    %cst_105 = arith.constant dense<0.000000e+00> : vector<8x128xf32>
    %310 = tpu.matmul %296, %206, %cst_105 {dimension_numbers = #tpu.dot_dimension_numbers<[1], [0], [0], [1], [0, 0, 1, 1], [], []>} : vector<8x32xf32>, vector<32x128xf32>, vector<8x128xf32> -> vector<8x128xf32>
    %311 = arith.addf %309, %310 : vector<8x128xf32>
    %312 = arith.negf %311 : vector<8x128xf32>
    %313 = math.exp %312 : vector<8x128xf32>
    %cst_106 = arith.constant 1.000000e+00 : f32
    %314 = vector.broadcast %cst_106 : f32 to vector<8x128xf32>
    %315 = arith.addf %314, %313 : vector<8x128xf32>
    %316 = arith.divf %314, %315 : vector<8x128xf32>
    %317 = math.tanh %311 : vector<8x128xf32>
    %318 = vector.extract_strided_slice %316 {offsets = [0, 0], sizes = [8, 32], strides = [1, 1]} : vector<8x128xf32> to vector<8x32xf32>
    %319 = vector.extract_strided_slice %316 {offsets = [0, 32], sizes = [8, 32], strides = [1, 1]} : vector<8x128xf32> to vector<8x32xf32>
    %320 = vector.extract_strided_slice %317 {offsets = [0, 64], sizes = [8, 32], strides = [1, 1]} : vector<8x128xf32> to vector<8x32xf32>
    %321 = vector.extract_strided_slice %316 {offsets = [0, 96], sizes = [8, 32], strides = [1, 1]} : vector<8x128xf32> to vector<8x32xf32>
    %322 = arith.mulf %319, %294 : vector<8x32xf32>
    %323 = arith.mulf %318, %320 : vector<8x32xf32>
    %324 = arith.addf %322, %323 : vector<8x32xf32>
    %325 = math.tanh %324 : vector<8x32xf32>
    %326 = arith.mulf %321, %325 : vector<8x32xf32>
    %327 = vector.broadcast %c3_i32_102 : i32 to vector<8x1xi32>
    %328 = arith.cmpi sgt, %0, %327 : vector<8x1xi32>
    %cst_107 = arith.constant 0.000000e+00 : f32
    %329 = vector.shape_cast %328 : vector<8x1xi1> to vector<8x1xi1>
    %330 = vector.broadcast %329 : vector<8x1xi1> to vector<8x32xi1>
    %331 = vector.broadcast %cst_107 : f32 to vector<8x32xf32>
    %332 = arith.select %330, %326, %331 : vector<8x32xi1>, vector<8x32xf32>
    %333 = arith.index_cast %c3_i32_102 : i32 to index
    %c0_108 = arith.constant 0 : index
    %c0_109 = arith.constant 0 : index
    %334 = vector.load %arg8[%333, %c0_108, %c0_109] : memref<8x8x32xf32, #tpu.memory_space<vmem>>, vector<1x8x32xf32>
    %335 = vector.shape_cast %334 : vector<1x8x32xf32> to vector<8x32xf32>
    %336 = vector.shape_cast %332 : vector<8x32xf32> to vector<1x8x32xf32>
    tpu.vector_store %arg8[%333, %c0_108, %c0_109], %336 {strides = array<i32>} : memref<8x8x32xf32, #tpu.memory_space<vmem>>, vector<1x8x32xf32>,
    %c4_i32_110 = arith.constant 4 : i32
    %337 = arith.index_cast %c4_i32_110 : i32 to index
    %c0_111 = arith.constant 0 : index
    %c0_112 = arith.constant 0 : index
    %338 = vector.load %arg10[%337, %c0_111, %c0_112] : memref<8x8x128xf32, #tpu.memory_space<vmem>>, vector<1x8x128xf32>
    %339 = vector.shape_cast %338 : vector<1x8x128xf32> to vector<8x128xf32>
    %cst_113 = arith.constant dense<0.000000e+00> : vector<8x128xf32>
    %340 = tpu.matmul %326, %206, %cst_113 {dimension_numbers = #tpu.dot_dimension_numbers<[1], [0], [0], [1], [0, 0, 1, 1], [], []>} : vector<8x32xf32>, vector<32x128xf32>, vector<8x128xf32> -> vector<8x128xf32>
    %341 = arith.addf %339, %340 : vector<8x128xf32>
    %342 = arith.negf %341 : vector<8x128xf32>
    %343 = math.exp %342 : vector<8x128xf32>
    %cst_114 = arith.constant 1.000000e+00 : f32
    %344 = vector.broadcast %cst_114 : f32 to vector<8x128xf32>
    %345 = arith.addf %344, %343 : vector<8x128xf32>
    %346 = arith.divf %344, %345 : vector<8x128xf32>
    %347 = math.tanh %341 : vector<8x128xf32>
    %348 = vector.extract_strided_slice %346 {offsets = [0, 0], sizes = [8, 32], strides = [1, 1]} : vector<8x128xf32> to vector<8x32xf32>
    %349 = vector.extract_strided_slice %346 {offsets = [0, 32], sizes = [8, 32], strides = [1, 1]} : vector<8x128xf32> to vector<8x32xf32>
    %350 = vector.extract_strided_slice %347 {offsets = [0, 64], sizes = [8, 32], strides = [1, 1]} : vector<8x128xf32> to vector<8x32xf32>
    %351 = vector.extract_strided_slice %346 {offsets = [0, 96], sizes = [8, 32], strides = [1, 1]} : vector<8x128xf32> to vector<8x32xf32>
    %352 = arith.mulf %349, %324 : vector<8x32xf32>
    %353 = arith.mulf %348, %350 : vector<8x32xf32>
    %354 = arith.addf %352, %353 : vector<8x32xf32>
    %355 = math.tanh %354 : vector<8x32xf32>
    %356 = arith.mulf %351, %355 : vector<8x32xf32>
    %357 = vector.broadcast %c4_i32_110 : i32 to vector<8x1xi32>
    %358 = arith.cmpi sgt, %0, %357 : vector<8x1xi32>
    %cst_115 = arith.constant 0.000000e+00 : f32
    %359 = vector.shape_cast %358 : vector<8x1xi1> to vector<8x1xi1>
    %360 = vector.broadcast %359 : vector<8x1xi1> to vector<8x32xi1>
    %361 = vector.broadcast %cst_115 : f32 to vector<8x32xf32>
    %362 = arith.select %360, %356, %361 : vector<8x32xi1>, vector<8x32xf32>
    %363 = arith.index_cast %c4_i32_110 : i32 to index
    %c0_116 = arith.constant 0 : index
    %c0_117 = arith.constant 0 : index
    %364 = vector.load %arg8[%363, %c0_116, %c0_117] : memref<8x8x32xf32, #tpu.memory_space<vmem>>, vector<1x8x32xf32>
    %365 = vector.shape_cast %364 : vector<1x8x32xf32> to vector<8x32xf32>
    %366 = vector.shape_cast %362 : vector<8x32xf32> to vector<1x8x32xf32>
    tpu.vector_store %arg8[%363, %c0_116, %c0_117], %366 {strides = array<i32>} : memref<8x8x32xf32, #tpu.memory_space<vmem>>, vector<1x8x32xf32>,
    %c5_i32_118 = arith.constant 5 : i32
    %367 = arith.index_cast %c5_i32_118 : i32 to index
    %c0_119 = arith.constant 0 : index
    %c0_120 = arith.constant 0 : index
    %368 = vector.load %arg10[%367, %c0_119, %c0_120] : memref<8x8x128xf32, #tpu.memory_space<vmem>>, vector<1x8x128xf32>
    %369 = vector.shape_cast %368 : vector<1x8x128xf32> to vector<8x128xf32>
    %cst_121 = arith.constant dense<0.000000e+00> : vector<8x128xf32>
    %370 = tpu.matmul %356, %206, %cst_121 {dimension_numbers = #tpu.dot_dimension_numbers<[1], [0], [0], [1], [0, 0, 1, 1], [], []>} : vector<8x32xf32>, vector<32x128xf32>, vector<8x128xf32> -> vector<8x128xf32>
    %371 = arith.addf %369, %370 : vector<8x128xf32>
    %372 = arith.negf %371 : vector<8x128xf32>
    %373 = math.exp %372 : vector<8x128xf32>
    %cst_122 = arith.constant 1.000000e+00 : f32
    %374 = vector.broadcast %cst_122 : f32 to vector<8x128xf32>
    %375 = arith.addf %374, %373 : vector<8x128xf32>
    %376 = arith.divf %374, %375 : vector<8x128xf32>
    %377 = math.tanh %371 : vector<8x128xf32>
    %378 = vector.extract_strided_slice %376 {offsets = [0, 0], sizes = [8, 32], strides = [1, 1]} : vector<8x128xf32> to vector<8x32xf32>
    %379 = vector.extract_strided_slice %376 {offsets = [0, 32], sizes = [8, 32], strides = [1, 1]} : vector<8x128xf32> to vector<8x32xf32>
    %380 = vector.extract_strided_slice %377 {offsets = [0, 64], sizes = [8, 32], strides = [1, 1]} : vector<8x128xf32> to vector<8x32xf32>
    %381 = vector.extract_strided_slice %376 {offsets = [0, 96], sizes = [8, 32], strides = [1, 1]} : vector<8x128xf32> to vector<8x32xf32>
    %382 = arith.mulf %379, %354 : vector<8x32xf32>
    %383 = arith.mulf %378, %380 : vector<8x32xf32>
    %384 = arith.addf %382, %383 : vector<8x32xf32>
    %385 = math.tanh %384 : vector<8x32xf32>
    %386 = arith.mulf %381, %385 : vector<8x32xf32>
    %387 = vector.broadcast %c5_i32_118 : i32 to vector<8x1xi32>
    %388 = arith.cmpi sgt, %0, %387 : vector<8x1xi32>
    %cst_123 = arith.constant 0.000000e+00 : f32
    %389 = vector.shape_cast %388 : vector<8x1xi1> to vector<8x1xi1>
    %390 = vector.broadcast %389 : vector<8x1xi1> to vector<8x32xi1>
    %391 = vector.broadcast %cst_123 : f32 to vector<8x32xf32>
    %392 = arith.select %390, %386, %391 : vector<8x32xi1>, vector<8x32xf32>
    %393 = arith.index_cast %c5_i32_118 : i32 to index
    %c0_124 = arith.constant 0 : index
    %c0_125 = arith.constant 0 : index
    %394 = vector.load %arg8[%393, %c0_124, %c0_125] : memref<8x8x32xf32, #tpu.memory_space<vmem>>, vector<1x8x32xf32>
    %395 = vector.shape_cast %394 : vector<1x8x32xf32> to vector<8x32xf32>
    %396 = vector.shape_cast %392 : vector<8x32xf32> to vector<1x8x32xf32>
    tpu.vector_store %arg8[%393, %c0_124, %c0_125], %396 {strides = array<i32>} : memref<8x8x32xf32, #tpu.memory_space<vmem>>, vector<1x8x32xf32>,
    %c6_i32_126 = arith.constant 6 : i32
    %397 = arith.index_cast %c6_i32_126 : i32 to index
    %c0_127 = arith.constant 0 : index
    %c0_128 = arith.constant 0 : index
    %398 = vector.load %arg10[%397, %c0_127, %c0_128] : memref<8x8x128xf32, #tpu.memory_space<vmem>>, vector<1x8x128xf32>
    %399 = vector.shape_cast %398 : vector<1x8x128xf32> to vector<8x128xf32>
    %cst_129 = arith.constant dense<0.000000e+00> : vector<8x128xf32>
    %400 = tpu.matmul %386, %206, %cst_129 {dimension_numbers = #tpu.dot_dimension_numbers<[1], [0], [0], [1], [0, 0, 1, 1], [], []>} : vector<8x32xf32>, vector<32x128xf32>, vector<8x128xf32> -> vector<8x128xf32>
    %401 = arith.addf %399, %400 : vector<8x128xf32>
    %402 = arith.negf %401 : vector<8x128xf32>
    %403 = math.exp %402 : vector<8x128xf32>
    %cst_130 = arith.constant 1.000000e+00 : f32
    %404 = vector.broadcast %cst_130 : f32 to vector<8x128xf32>
    %405 = arith.addf %404, %403 : vector<8x128xf32>
    %406 = arith.divf %404, %405 : vector<8x128xf32>
    %407 = math.tanh %401 : vector<8x128xf32>
    %408 = vector.extract_strided_slice %406 {offsets = [0, 0], sizes = [8, 32], strides = [1, 1]} : vector<8x128xf32> to vector<8x32xf32>
    %409 = vector.extract_strided_slice %406 {offsets = [0, 32], sizes = [8, 32], strides = [1, 1]} : vector<8x128xf32> to vector<8x32xf32>
    %410 = vector.extract_strided_slice %407 {offsets = [0, 64], sizes = [8, 32], strides = [1, 1]} : vector<8x128xf32> to vector<8x32xf32>
    %411 = vector.extract_strided_slice %406 {offsets = [0, 96], sizes = [8, 32], strides = [1, 1]} : vector<8x128xf32> to vector<8x32xf32>
    %412 = arith.mulf %409, %384 : vector<8x32xf32>
    %413 = arith.mulf %408, %410 : vector<8x32xf32>
    %414 = arith.addf %412, %413 : vector<8x32xf32>
    %415 = math.tanh %414 : vector<8x32xf32>
    %416 = arith.mulf %411, %415 : vector<8x32xf32>
    %417 = vector.broadcast %c6_i32_126 : i32 to vector<8x1xi32>
    %418 = arith.cmpi sgt, %0, %417 : vector<8x1xi32>
    %cst_131 = arith.constant 0.000000e+00 : f32
    %419 = vector.shape_cast %418 : vector<8x1xi1> to vector<8x1xi1>
    %420 = vector.broadcast %419 : vector<8x1xi1> to vector<8x32xi1>
    %421 = vector.broadcast %cst_131 : f32 to vector<8x32xf32>
    %422 = arith.select %420, %416, %421 : vector<8x32xi1>, vector<8x32xf32>
    %423 = arith.index_cast %c6_i32_126 : i32 to index
    %c0_132 = arith.constant 0 : index
    %c0_133 = arith.constant 0 : index
    %424 = vector.load %arg8[%423, %c0_132, %c0_133] : memref<8x8x32xf32, #tpu.memory_space<vmem>>, vector<1x8x32xf32>
    %425 = vector.shape_cast %424 : vector<1x8x32xf32> to vector<8x32xf32>
    %426 = vector.shape_cast %422 : vector<8x32xf32> to vector<1x8x32xf32>
    tpu.vector_store %arg8[%423, %c0_132, %c0_133], %426 {strides = array<i32>} : memref<8x8x32xf32, #tpu.memory_space<vmem>>, vector<1x8x32xf32>,
    %c7_i32_134 = arith.constant 7 : i32
    %427 = arith.index_cast %c7_i32_134 : i32 to index
    %c0_135 = arith.constant 0 : index
    %c0_136 = arith.constant 0 : index
    %428 = vector.load %arg10[%427, %c0_135, %c0_136] : memref<8x8x128xf32, #tpu.memory_space<vmem>>, vector<1x8x128xf32>
    %429 = vector.shape_cast %428 : vector<1x8x128xf32> to vector<8x128xf32>
    %cst_137 = arith.constant dense<0.000000e+00> : vector<8x128xf32>
    %430 = tpu.matmul %416, %206, %cst_137 {dimension_numbers = #tpu.dot_dimension_numbers<[1], [0], [0], [1], [0, 0, 1, 1], [], []>} : vector<8x32xf32>, vector<32x128xf32>, vector<8x128xf32> -> vector<8x128xf32>
    %431 = arith.addf %429, %430 : vector<8x128xf32>
    %432 = arith.negf %431 : vector<8x128xf32>
    %433 = math.exp %432 : vector<8x128xf32>
    %cst_138 = arith.constant 1.000000e+00 : f32
    %434 = vector.broadcast %cst_138 : f32 to vector<8x128xf32>
    %435 = arith.addf %434, %433 : vector<8x128xf32>
    %436 = arith.divf %434, %435 : vector<8x128xf32>
    %437 = math.tanh %431 : vector<8x128xf32>
    %438 = vector.extract_strided_slice %436 {offsets = [0, 0], sizes = [8, 32], strides = [1, 1]} : vector<8x128xf32> to vector<8x32xf32>
    %439 = vector.extract_strided_slice %436 {offsets = [0, 32], sizes = [8, 32], strides = [1, 1]} : vector<8x128xf32> to vector<8x32xf32>
    %440 = vector.extract_strided_slice %437 {offsets = [0, 64], sizes = [8, 32], strides = [1, 1]} : vector<8x128xf32> to vector<8x32xf32>
    %441 = vector.extract_strided_slice %436 {offsets = [0, 96], sizes = [8, 32], strides = [1, 1]} : vector<8x128xf32> to vector<8x32xf32>
    %442 = arith.mulf %439, %414 : vector<8x32xf32>
    %443 = arith.mulf %438, %440 : vector<8x32xf32>
    %444 = arith.addf %442, %443 : vector<8x32xf32>
    %445 = math.tanh %444 : vector<8x32xf32>
    %446 = arith.mulf %441, %445 : vector<8x32xf32>
    %447 = vector.broadcast %c7_i32_134 : i32 to vector<8x1xi32>
    %448 = arith.cmpi sgt, %0, %447 : vector<8x1xi32>
    %cst_139 = arith.constant 0.000000e+00 : f32
    %449 = vector.shape_cast %448 : vector<8x1xi1> to vector<8x1xi1>
    %450 = vector.broadcast %449 : vector<8x1xi1> to vector<8x32xi1>
    %451 = vector.broadcast %cst_139 : f32 to vector<8x32xf32>
    %452 = arith.select %450, %446, %451 : vector<8x32xi1>, vector<8x32xf32>
    %453 = arith.index_cast %c7_i32_134 : i32 to index
    %c0_140 = arith.constant 0 : index
    %c0_141 = arith.constant 0 : index
    %454 = vector.load %arg8[%453, %c0_140, %c0_141] : memref<8x8x32xf32, #tpu.memory_space<vmem>>, vector<1x8x32xf32>
    %455 = vector.shape_cast %454 : vector<1x8x32xf32> to vector<8x32xf32>
    %456 = vector.shape_cast %452 : vector<8x32xf32> to vector<1x8x32xf32>
    tpu.vector_store %arg8[%453, %c0_140, %c0_141], %456 {strides = array<i32>} : memref<8x8x32xf32, #tpu.memory_space<vmem>>, vector<1x8x32xf32>,
    %c8_i32_142 = arith.constant 8 : i32
    return
  }
}

</mosaic_0001>

<bundles_post_ra>
// kernel: _decoder_forward.1
= control target key start
LH: loop header
LB: loop body
LE: loop exit
PB: predicated region body
PF: predicated region fallthrough
CT: control target
= control target key end

     0   :  { %v2723_v2 = vmov 0.0|0.0   ;;  %vm53_vm0 = vcmask 261120   ;;  %vm2724_vm1 = vmmov 0   ;;  %v2725_v4 = vmov 0.0   ;;  %s2726_s25 = smov 64   ;;  %s3187_s1 = inlined_call_operand.vmem [shape: f32[32,128], index: 1, kind: input, shape index: {}]   ;;  %s3188_s2 = inlined_call_operand.vmem [shape: f32[32,128], index: 2, kind: input, shape index: {}]   ;;  %s3189_s0 = inlined_call_operand.vmem [shape: f32[8,8,32], index: 0, kind: input, shape index: {}]   ;;  %s3190_s3 = inlined_call_operand.vmem [shape: f32[1,128], index: 3, kind: input, shape index: {}]   ;;  %s3191_s4 = inlined_call_operand.vmem [shape: f32[32,128], index: 4, kind: input, shape index: {}]   ;;  %s3192_s5 = inlined_call_operand.vmem [shape: f32[32,128], index: 5, kind: input, shape index: {}]   ;;  %s3193_s6 = inlined_call_operand.vmem [shape: f32[1,128], index: 6, kind: input, shape index: {}]   ;;  %s3194_s7 = inlined_call_operand.vmem [shape: s32[8,1], index: 7, kind: input, shape index: {}]   ;;  %s3195_s8 = inlined_call_operand.vmem [shape: f32[8,8,32], index: 8, kind: output, shape index: {}]  }
   0x1   :  { %v30_v0 = vld [vmem:[%s3187_s1] sm:$0xff]  ;;  %v31_v1 = vld [vmem:[%s3187_s1 + $0x8] sm:$0xff]  ;;  %2483 = vmatprep.subr.bf16.mxu1 %v2723_v2  ;;  %2287 = vmatprep.mubr.msk.f32.mxu1 %vm2724_vm1, %v2725_v4  ;;  %v32_v7 = vld [vmem:[%s3187_s1 + $0x10] sm:$0xff] }
   0x2   :  { %v34_v3 = vld [vmem:[%s3188_s2] sm:$0xff]  ;;  %v2475_v5 = vpack.c.bf16 %v31_v1, %v30_v0  ;;  %v35_v6 = vld [vmem:[%s3188_s2 + $0x8] sm:$0xff]  ;;  %v33_v8 = vld [vmem:[%s3187_s1 + $0x18] sm:$0xff] }
   0x3   :  { %v2795_v9 = vpack.c.bf16 %v35_v6, %v34_v3  ;;  %v2479_v10 = vpack.c.bf16 %v33_v8, %v32_v7  ;;  %v39_v11 = vld [vmem:[%s3189_s0] sm:$0xff]  ;;  %v36_v12 = vld [vmem:[%s3188_s2 + $0x10] sm:$0xff]  ;;  %v37_v13 = vld [vmem:[%s3188_s2 + $0x18] sm:$0xff] }
   0x4   :  { %2476 = vmatprep.subr.bf16.mxu0 %v2475_v5  ;;  %2267 = vmatprep.mubr.msk.f32.mxu0 %vm53_vm0, %v39_v11  ;;  %v2808_v14 = vpack.c.bf16 %v37_v13, %v36_v12  ;;  %v40_v15 = vld [vmem:[%s3189_s0 + $0x8] sm:$0xff]  ;;  %v2832_v16 = vld [vmem:[%s3190_s3] ss:$0 sm:$0xff]  ;;  %s2727_s3 = smov 32   ;;  %v41_v51 = vld [vmem:[%s3189_s0 + $0x10] sm:$0xff] }
   0x5   :  { %2478 = vmatpush3.bf16.msra.mxu0 %v2475_v5  ;;  %2485 = vmatpush3.bf16.msra.mxu1 %v2795_v9  ;;  %v42_v52 = vld [vmem:[%s3189_s0 + $0x18] sm:$0xff]  ;;  %v43_v53 = vld [vmem:[%s3189_s0 + $0x20] sm:$0xff]  ;;  %v44_v54 = vld [vmem:[%s3189_s0 + $0x28] sm:$0xff] }
   0x6   :  { %2480 = vmatprep.subr.bf16.mxu0 %v2479_v10  ;;  %2486 = vmatprep.subr.bf16.mxu1 %v2723_v2  ;;  %v45_v55 = vld [vmem:[%s3189_s0 + $0x30] sm:$0xff]  ;;  %v46_v56 = vld [vmem:[%s3189_s0 + $0x38] sm:$0xff] }
   0x9   :  { %2482 = vmatpush3.bf16.msra.mxu0 %v2479_v10  ;;  %2488 = vmatpush3.bf16.msra.mxu1 %v2808_v14 }
   0xa   :  { %2489 = vmatprep.subr.bf16.mxu1 %v2723_v2  ;;  %2495 = vmatprep.subr.bf16.mxu0 %v2723_v2 }
   0xc   :  { %2268 = vmatmul.mubr.msk.f32.vlgmr.msra.gmra.mrb[0].mxu0 %vm53_vm0, %v40_v15  ;;  %2288 = vmatmul.mubr.f32.vlgmr.msra.gmra.mrb[0].mxu1 %v2725_v4 }
   0xd   :  { %2491 = vmatpush3.bf16.msra.mxu1 %v2795_v9  ;;  %2298 = vmatprep.mubr.msk.f32.mxu1 %vm2724_vm1, %v2725_v4 }
   0xe   :  { %2492 = vmatprep.subr.bf16.mxu1 %v2723_v2  ;;  %2497 = vmatpush3.bf16.msra.mxu0 %v2795_v9 }
   0xf   :  { %2498 = vmatprep.subr.bf16.mxu0 %v2723_v2  ;;  %2270 = vmatprep.mubr.msk.f32.mxu0 %vm53_vm0, %v41_v51 }
  0x10   :  { %2271 = vmatmul.mubr.msk.f32.gmra.mrb[2].mxu0 %vm53_vm0, %v42_v52 }
  0x11   :  { %2494 = vmatpush3.bf16.msra.mxu1 %v2808_v14  ;;  %2273 = vmatprep.mubr.msk.f32.mxu0 %vm53_vm0, %v43_v53 }
  0x12   :  { %2500 = vmatpush3.bf16.msra.mxu0 %v2808_v14  ;;  %2501 = vmatprep.subr.bf16.mxu1 %v2723_v2 }
  0x13   :  { %2507 = vmatprep.subr.bf16.mxu0 %v2723_v2 }
  0x14   :  { %2274 = vmatmul.mubr.msk.f32.gmra.mrb[4].mxu0 %vm53_vm0, %v44_v54 }
  0x15   :  { %2276 = vmatprep.mubr.msk.f32.mxu0 %vm53_vm0, %v45_v55 }
  0x18   :  { %2277 = vmatmul.mubr.msk.f32.gmra.mrb[6].mxu0 %vm53_vm0, %v46_v56 }
  0x19   :  { %2309 = vmatprep.mubr.msk.f32.mxu0 %vm2724_vm1, %v2725_v4 }
  0xdf   :  { %v2269_v17 = vpop.f32.mrb[0].mxu0  ;;  %v261_v18 = vpop.f32.mrb[0].mxu1 }
  0xe0   :  { %v144_v19 = vpop.f32.mrb[1].mxu0  ;;  %v2289_v20 = vpop.f32.mrb[1].mxu1  ;;  %v150_v37 = vadd.f32 %v2269_v17, %v2832_v16 }
  0xe1   :  { %v145_v21 = vadd.f32 %v2832_v16, %v144_v19 }
  0xe3   :  { %v265_v22 = vadd.f32 %v261_v18, %v145_v21  ;;  %v2272_v60 = vpop.f32.mrb[2].mxu0 }
  0xe4   :  { %v154_v61 = vpop.f32.mrb[3].mxu0 }
  0xe5   :  { %2595 = vtanh.f32 %v265_v22  ;;  %v2109_v24 = vmul.f32 -1.442695, %v265_v22  ;;  %v155_v5 = vadd.f32 %v2832_v16, %v154_v61 }
  0xe7   :  { %2597 = vpow2.f32 %v2109_v24  ;;  %v2878_v62 = vpop.f32.mrb[4].mxu0 }
  0xe8   :  { %v2880_v63 = vpop.f32.mrb[5].mxu0 }
  0xeb   :  { %v2882_v0 = vpop.f32.mrb[6].mxu0 }
  0xec   :  { %v2884_v1 = vpop.f32.mrb[7].mxu0 }
  0xef   :  { %v2596_v23 = vpop.eup %2595 }
  0xf0   :  { %275 = vrot.lane.b32.xlu0 %v2596_v23, %s2726_s25 }
  0xf1   :  { %v2598_v25 = vpop.eup %2597 }
  0xf2   :  { %v269_v26 = vadd.f32 1.0, %v2598_v25 }
  0xf4   :  { %2599 = vrcp.f32 %v269_v26  ;;  %v160_v26 = vadd.f32 %v2272_v60, %v2832_v16 }
  0xfe   :  { %v2600_v27 = vpop.eup %2599 }
  0xff   :  { %v273_v30 = vmul.f32 0.0, %v2600_v27 }
 0x162   :  { %v276_v28 = vpop.permute.xlu0 %275 }
 0x163   :  { %v278_v29 = vmul.f32 %v2600_v27, %v276_v28 }
 0x165   :  { %280 = vrot.lane.b32.xlu0 %v278_v29, %s2727_s3 }
 0x1d7   :  { %v281_v31 = vpop.permute.xlu0 %280 }
 0x1d8   :  { %v283_v32 = vadd.f32 %v281_v31, %v273_v30 }
 0x1da   :  { %2601 = vtanh.f32 %v283_v32 }
 0x1e4   :  { %v2602_v33 = vpop.eup %2601 }
 0x1e5   :  { %286 = vrot.lane.b32.xlu1 %v2602_v33, %s2726_s25 }
 0x257   :  { %v287_v34 = vpop.permute.xlu1 %286 }
 0x258   :  { %v289_v35 = vmul.f32 %v2600_v27, %v287_v34 }
 0x25a   :  { %291 = vrot.lane.b32.xlu1 %v289_v35, %s2727_s3 }
 0x2cc   :  { %v292_v36 = vpop.permute.xlu1 %291 }
 0x2cd   :  { %294 = vst.msk [vmem:[#allocation2] sm:$0xff] %vm53_vm0, %v292_v36  ;;  %2299 = vmatmul.mubr.msk.f32.vlgmr.msra.gmra.mrb[2].mxu1 %vm53_vm0, %v292_v36 }
 0x2ce   :  { %2503 = vmatpush3.bf16.msra.mxu1 %v2795_v9  ;;  %2320 = vmatprep.mubr.msk.f32.mxu1 %vm2724_vm1, %v2725_v4 }
 0x2cf   :  { %2504 = vmatprep.subr.bf16.mxu1 %v2723_v2 }
 0x2d2   :  { %2506 = vmatpush3.bf16.msra.mxu1 %v2808_v14 }
 0x2d3   :  { %2513 = vmatprep.subr.bf16.mxu1 %v2723_v2 }
 0x3a0   :  { %v365_v38 = vpop.f32.mrb[2].mxu1 }
 0x3a1   :  { %v369_v39 = vadd.f32 %v365_v38, %v150_v37  ;;  %v2300_v40 = vpop.f32.mrb[3].mxu1 }
 0x3a3   :  { %2603 = vtanh.f32 %v369_v39  ;;  %v2111_v42 = vmul.f32 -1.442695, %v369_v39 }
 0x3a5   :  { %2605 = vpow2.f32 %v2111_v42 }
 0x3ad   :  { %v2604_v41 = vpop.eup %2603 }
 0x3ae   :  { %379 = vrot.lane.b32.xlu0 %v2604_v41, %s2726_s25 }
 0x3af   :  { %v2606_v43 = vpop.eup %2605 }
 0x3b0   :  { %v373_v44 = vadd.f32 1.0, %v2606_v43 }
 0x3b2   :  { %2607 = vrcp.f32 %v373_v44  ;;  %v165_v44 = vadd.f32 %v2832_v16, %v2880_v63  ;;  %v170_v63 = vadd.f32 %v2878_v62, %v2832_v16 }
 0x3bc   :  { %v2608_v45 = vpop.eup %2607 }
 0x3bd   :  { %v377_v48 = vmul.f32 %v2608_v45, %v283_v32 }
 0x420   :  { %v380_v46 = vpop.permute.xlu0 %379 }
 0x421   :  { %v382_v47 = vmul.f32 %v2608_v45, %v380_v46 }
 0x423   :  { %384 = vrot.lane.b32.xlu1 %v382_v47, %s2727_s3 }
 0x495   :  { %v385_v49 = vpop.permute.xlu1 %384 }
 0x496   :  { %v387_v50 = vadd.f32 %v385_v49, %v377_v48 }
 0x498   :  { %2609 = vtanh.f32 %v387_v50 }
 0x4a2   :  { %v2610_v57 = vpop.eup %2609 }
 0x4a3   :  { %390 = vrot.lane.b32.xlu0 %v2610_v57, %s2726_s25 }
 0x515   :  { %v391_v58 = vpop.permute.xlu0 %390 }
 0x516   :  { %v393_v59 = vmul.f32 %v2608_v45, %v391_v58 }
 0x518   :  { %395 = vrot.lane.b32.xlu1 %v393_v59, %s2727_s3 }
 0x58a   :  { %v396_v3 = vpop.permute.xlu1 %395 }
 0x58b   :  { %399 = vst.msk [vmem:[#allocation2 + $0x8] sm:$0xff] %vm53_vm0, %v396_v3  ;;  %2310 = vmatmul.mubr.msk.f32.vlgmr.msra.gmra.mrb[8].mxu0 %vm53_vm0, %v396_v3 }
 0x58c   :  { %2509 = vmatpush3.bf16.msra.mxu0 %v2795_v9  ;;  %2331 = vmatprep.mubr.msk.f32.mxu0 %vm2724_vm1, %v2725_v4 }
 0x58d   :  { %2510 = vmatprep.subr.bf16.mxu0 %v2723_v2 }
 0x590   :  { %2512 = vmatpush3.bf16.msra.mxu0 %v2808_v14 }
 0x591   :  { %2519 = vmatprep.subr.bf16.mxu0 %v2723_v2 }
 0x65e   :  { %v470_v6 = vpop.f32.mrb[8].mxu0 }
 0x65f   :  { %v474_v7 = vadd.f32 %v470_v6, %v155_v5  ;;  %v2311_v8 = vpop.f32.mrb[9].mxu0 }
 0x661   :  { %2611 = vtanh.f32 %v474_v7  ;;  %v2113_v11 = vmul.f32 -1.442695, %v474_v7 }
 0x663   :  { %2613 = vpow2.f32 %v2113_v11 }
 0x66b   :  { %v2612_v10 = vpop.eup %2611 }
 0x66c   :  { %484 = vrot.lane.b32.xlu0 %v2612_v10, %s2726_s25 }
 0x66d   :  { %v2614_v12 = vpop.eup %2613 }
 0x66e   :  { %v478_v13 = vadd.f32 1.0, %v2614_v12 }
 0x670   :  { %2615 = vrcp.f32 %v478_v13 }
 0x67a   :  { %v2616_v15 = vpop.eup %2615 }
 0x67b   :  { %v482_v19 = vmul.f32 %v2616_v15, %v387_v50 }
 0x6de   :  { %v485_v17 = vpop.permute.xlu0 %484 }
 0x6df   :  { %v487_v18 = vmul.f32 %v2616_v15, %v485_v17  ;;  %v1030_v17 = vld [vmem:[%s3191_s4] sm:$0xff] }
 0x6e1   :  { %489 = vrot.lane.b32.xlu1 %v487_v18, %s2727_s3  ;;  %v1031_v18 = vld [vmem:[%s3191_s4 + $0x8] sm:$0xff] }
 0x753   :  { %v490_v20 = vpop.permute.xlu1 %489 }
 0x754   :  { %v492_v21 = vadd.f32 %v490_v20, %v482_v19  ;;  %v2531_v19 = vpack.c.bf16 %v1031_v18, %v1030_v17 }
 0x756   :  { %2617 = vtanh.f32 %v492_v21 }
 0x760   :  { %v2618_v22 = vpop.eup %2617 }
 0x761   :  { %495 = vrot.lane.b32.xlu0 %v2618_v22, %s2726_s25 }
 0x7d3   :  { %v496_v23 = vpop.permute.xlu0 %495 }
 0x7d4   :  { %v498_v24 = vmul.f32 %v2616_v15, %v496_v23  ;;  %v1032_v23 = vld [vmem:[%s3191_s4 + $0x10] sm:$0xff] }
 0x7d6   :  { %500 = vrot.lane.b32.xlu1 %v498_v24, %s2727_s3  ;;  %v1033_v24 = vld [vmem:[%s3191_s4 + $0x18] sm:$0xff] }
 0x848   :  { %v501_v25 = vpop.permute.xlu1 %500 }
 0x849   :  { %504 = vst.msk [vmem:[#allocation2 + $0x10] sm:$0xff] %vm53_vm0, %v501_v25  ;;  %2321 = vmatmul.mubr.msk.f32.vlgmr.msra.gmra.mrb[4].mxu1 %vm53_vm0, %v501_v25  ;;  %v2535_v25 = vpack.c.bf16 %v1033_v24, %v1032_v23 }
 0x84a   :  { %2515 = vmatpush3.bf16.msra.mxu1 %v2795_v9  ;;  %2342 = vmatprep.mubr.msk.f32.mxu1 %vm2724_vm1, %v2725_v4 }
 0x84b   :  { %2516 = vmatprep.subr.bf16.mxu1 %v2723_v2 }
 0x84e   :  { %2518 = vmatpush3.bf16.msra.mxu1 %v2808_v14 }
 0x84f   :  { %2525 = vmatprep.subr.bf16.mxu1 %v2723_v2 }
 0x91c   :  { %v575_v27 = vpop.f32.mrb[4].mxu1 }
 0x91d   :  { %v579_v28 = vadd.f32 %v575_v27, %v160_v26  ;;  %v2322_v29 = vpop.f32.mrb[5].mxu1  ;;  %v1039_v27 = vld [vmem:[#allocation2] sm:$0xff] }
 0x91e   :  { %v1041_v29 = vld [vmem:[#allocation2 + $0x10] sm:$0xff] }
 0x91f   :  { %2619 = vtanh.f32 %v579_v28  ;;  %v2115_v31 = vmul.f32 -1.442695, %v579_v28  ;;  %v1040_v28 = vld [vmem:[#allocation2 + $0x8] sm:$0xff] }
 0x921   :  { %2621 = vpow2.f32 %v2115_v31 }
 0x929   :  { %v2620_v30 = vpop.eup %2619 }
 0x92a   :  { %589 = vrot.lane.b32.xlu0 %v2620_v30, %s2726_s25 }
 0x92b   :  { %v2622_v32 = vpop.eup %2621 }
 0x92c   :  { %v583_v33 = vadd.f32 1.0, %v2622_v32 }
 0x92e   :  { %2623 = vrcp.f32 %v583_v33  ;;  %v175_v33 = vadd.f32 %v2832_v16, %v2884_v1 }
 0x938   :  { %v2624_v34 = vpop.eup %2623 }
 0x939   :  { %v587_v37 = vmul.f32 %v2624_v34, %v492_v21 }
 0x99c   :  { %v590_v35 = vpop.permute.xlu0 %589 }
 0x99d   :  { %v592_v36 = vmul.f32 %v2624_v34, %v590_v35 }
 0x99f   :  { %594 = vrot.lane.b32.xlu1 %v592_v36, %s2727_s3 }
 0xa11   :  { %v595_v38 = vpop.permute.xlu1 %594 }
 0xa12   :  { %v597_v39 = vadd.f32 %v595_v38, %v587_v37 }
 0xa14   :  { %2625 = vtanh.f32 %v597_v39 }
 0xa1e   :  { %v2626_v40 = vpop.eup %2625 }
 0xa1f   :  { %600 = vrot.lane.b32.xlu0 %v2626_v40, %s2726_s25 }
 0xa91   :  { %v601_v41 = vpop.permute.xlu0 %600 }
 0xa92   :  { %v603_v42 = vmul.f32 %v2624_v34, %v601_v41 }
 0xa94   :  { %605 = vrot.lane.b32.xlu1 %v603_v42, %s2727_s3 }
 0xb06   :  { %v606_v43 = vpop.permute.xlu1 %605 }
 0xb07   :  { %609 = vst.msk [vmem:[#allocation2 + $0x18] sm:$0xff] %vm53_vm0, %v606_v43  ;;  %2332 = vmatmul.mubr.msk.f32.vlgmr.msra.gmra.mrb[10].mxu0 %vm53_vm0, %v606_v43 }
 0xb08   :  { %2521 = vmatpush3.bf16.msra.mxu0 %v2795_v9  ;;  %2353 = vmatprep.mubr.msk.f32.mxu0 %vm2724_vm1, %v2725_v4 }
 0xb09   :  { %2522 = vmatprep.subr.bf16.mxu0 %v2723_v2 }
 0xb0c   :  { %2524 = vmatpush3.bf16.msra.mxu0 %v2808_v14 }
 0xb0d   :  { %2532 = vmatprep.subr.bf16.mxu0 %v2531_v19 }
 0xb0e   :  { %v1042_v30 = vld [vmem:[#allocation2 + $0x18] sm:$0xff] }
 0xbda   :  { %v680_v45 = vpop.f32.mrb[10].mxu0 }
 0xbdb   :  { %v684_v46 = vadd.f32 %v680_v45, %v165_v44  ;;  %v2333_v47 = vpop.f32.mrb[11].mxu0 }
 0xbdd   :  { %2627 = vtanh.f32 %v684_v46  ;;  %v2117_v49 = vmul.f32 -1.442695, %v684_v46 }
 0xbdf   :  { %2629 = vpow2.f32 %v2117_v49 }
 0xbe7   :  { %v2628_v48 = vpop.eup %2627 }
 0xbe8   :  { %694 = vrot.lane.b32.xlu0 %v2628_v48, %s2726_s25 }
 0xbe9   :  { %v2630_v50 = vpop.eup %2629 }
 0xbea   :  { %v688_v51 = vadd.f32 1.0, %v2630_v50 }
 0xbec   :  { %2631 = vrcp.f32 %v688_v51 }
 0xbf6   :  { %v2632_v52 = vpop.eup %2631 }
 0xbf7   :  { %v692_v55 = vmul.f32 %v2632_v52, %v597_v39 }
 0xc5a   :  { %v695_v53 = vpop.permute.xlu0 %694 }
 0xc5b   :  { %v697_v54 = vmul.f32 %v2632_v52, %v695_v53  ;;  %v1034_v53 = vld [vmem:[%s3192_s5] sm:$0xff] }
 0xc5d   :  { %699 = vrot.lane.b32.xlu1 %v697_v54, %s2727_s3  ;;  %v1035_v54 = vld [vmem:[%s3192_s5 + $0x8] sm:$0xff] }
 0xccf   :  { %v700_v56 = vpop.permute.xlu1 %699 }
 0xcd0   :  { %v702_v57 = vadd.f32 %v700_v56, %v692_v55  ;;  %v2984_v55 = vpack.c.bf16 %v1035_v54, %v1034_v53  ;;  %v1036_v56 = vld [vmem:[%s3192_s5 + $0x10] sm:$0xff] }
 0xcd2   :  { %2633 = vtanh.f32 %v702_v57 }
 0xcdc   :  { %v2634_v58 = vpop.eup %2633 }
 0xcdd   :  { %705 = vrot.lane.b32.xlu0 %v2634_v58, %s2726_s25 }
 0xd4f   :  { %v706_v59 = vpop.permute.xlu0 %705 }
 0xd50   :  { %v708_v60 = vmul.f32 %v2632_v52, %v706_v59 }
 0xd52   :  { %710 = vrot.lane.b32.xlu1 %v708_v60, %s2727_s3 }
 0xdc4   :  { %v711_v61 = vpop.permute.xlu1 %710 }
 0xdc5   :  { %714 = vst.msk [vmem:[#allocation2 + $0x20] sm:$0xff] %vm53_vm0, %v711_v61  ;;  %2343 = vmatmul.mubr.msk.f32.vlgmr.msra.gmra.mrb[6].mxu1 %vm53_vm0, %v711_v61 }
 0xdc6   :  { %2527 = vmatpush3.bf16.msra.mxu1 %v2795_v9  ;;  %2364 = vmatprep.mubr.msk.f32.mxu1 %vm2724_vm1, %v2725_v4 }
 0xdc7   :  { %2528 = vmatprep.subr.bf16.mxu1 %v2723_v2 }
 0xdca   :  { %2530 = vmatpush3.bf16.msra.mxu1 %v2808_v14 }
 0xdcb   :  { %2539 = vmatprep.subr.bf16.mxu1 %v2723_v2 }
 0xdcc   :  { %v1043_v31 = vld [vmem:[#allocation2 + $0x20] sm:$0xff] }
 0xe98   :  { %v785_v3 = vpop.f32.mrb[6].mxu1 }
 0xe99   :  { %v789_v5 = vadd.f32 %v785_v3, %v170_v63  ;;  %v2344_v6 = vpop.f32.mrb[7].mxu1  ;;  %v180_v3 = vadd.f32 %v2882_v0, %v2832_v16 }
 0xe9b   :  { %2635 = vtanh.f32 %v789_v5  ;;  %v2119_v9 = vmul.f32 -1.442695, %v789_v5 }
 0xe9d   :  { %2637 = vpow2.f32 %v2119_v9  ;;  %v3020_v9 = vld [vmem:[%s3193_s6] ss:$0 sm:$0xff] }
 0xea5   :  { %v2636_v7 = vpop.eup %2635 }
 0xea6   :  { %799 = vrot.lane.b32.xlu0 %v2636_v7, %s2726_s25 }
 0xea7   :  { %v2638_v8 = vpop.eup %2637 }
 0xea8   :  { %v793_v10 = vadd.f32 1.0, %v2638_v8 }
 0xeaa   :  { %2639 = vrcp.f32 %v793_v10 }
 0xeb4   :  { %v2640_v11 = vpop.eup %2639 }
 0xeb5   :  { %v797_v13 = vmul.f32 %v2640_v11, %v702_v57  ;;  %v1037_v57 = vld [vmem:[%s3192_s5 + $0x18] sm:$0xff] }
 0xeb6   :  { %v2994_v58 = vpack.c.bf16 %v1037_v57, %v1036_v56 }
 0xf18   :  { %v800_v12 = vpop.permute.xlu0 %799 }
 0xf19   :  { %v802_v14 = vmul.f32 %v2640_v11, %v800_v12 }
 0xf1b   :  { %804 = vrot.lane.b32.xlu1 %v802_v14, %s2727_s3 }
 0xf8d   :  { %v805_v15 = vpop.permute.xlu1 %804 }
 0xf8e   :  { %v807_v62 = vadd.f32 %v805_v15, %v797_v13 }
 0xf90   :  { %2641 = vtanh.f32 %v807_v62 }
 0xf9a   :  { %v2642_v20 = vpop.eup %2641 }
 0xf9b   :  { %810 = vrot.lane.b32.xlu0 %v2642_v20, %s2726_s25 }
0x100d   :  { %v811_v21 = vpop.permute.xlu0 %810 }
0x100e   :  { %v813_v22 = vmul.f32 %v2640_v11, %v811_v21 }
0x1010   :  { %815 = vrot.lane.b32.xlu1 %v813_v22, %s2727_s3 }
0x1082   :  { %v816_v26 = vpop.permute.xlu1 %815 }
0x1083   :  { %819 = vst.msk [vmem:[#allocation2 + $0x28] sm:$0xff] %vm53_vm0, %v816_v26  ;;  %2354 = vmatmul.mubr.msk.f32.vlgmr.msra.gmra.mrb[12].mxu0 %vm53_vm0, %v816_v26 }
0x1084   :  { %2534 = vmatpush3.bf16.msra.mxu0 %v2531_v19  ;;  %2375 = vmatprep.mubr.msk.f32.mxu0 %vm53_vm0, %v1039_v27 }
0x1085   :  { %2536 = vmatprep.subr.bf16.mxu0 %v2535_v25 }
0x1088   :  { %2538 = vmatpush3.bf16.msra.mxu0 %v2535_v25 }
0x1089   :  { %2551 = vmatprep.subr.bf16.mxu0 %v2723_v2 }
0x108a   :  { %v1044_v32 = vld [vmem:[#allocation2 + $0x28] sm:$0xff] }
0x108b   :  { %2376 = vmatmul.mubr.msk.f32.vlgmr.msra.gmra.mrb[14].mxu0 %vm53_vm0, %v1040_v28 }
0x108c   :  { %2378 = vmatprep.mubr.msk.f32.mxu0 %vm53_vm0, %v1041_v29  ;;  %2553 = vmatpush3.bf16.msra.mxu0 %v2984_v55 }
0x108d   :  { %2554 = vmatprep.subr.bf16.mxu0 %v2723_v2 }
0x108f   :  { %2379 = vmatmul.mubr.msk.f32.gmra.mrb[16].mxu0 %vm53_vm0, %v1042_v30 }
0x1090   :  { %2381 = vmatprep.mubr.msk.f32.mxu0 %vm53_vm0, %v1043_v31  ;;  %2556 = vmatpush3.bf16.msra.mxu0 %v2994_v58 }
0x1091   :  { %2563 = vmatprep.subr.bf16.mxu0 %v2723_v2 }
0x1093   :  { %2382 = vmatmul.mubr.msk.f32.gmra.mrb[18].mxu0 %vm53_vm0, %v1044_v32 }
0x1156   :  { %v890_v34 = vpop.f32.mrb[12].mxu0 }
0x1157   :  { %v894_v35 = vadd.f32 %v890_v34, %v175_v33  ;;  %v2355_v36 = vpop.f32.mrb[13].mxu0 }
0x1159   :  { %2643 = vtanh.f32 %v894_v35  ;;  %v2121_v44 = vmul.f32 -1.442695, %v894_v35 }
0x115b   :  { %2645 = vpow2.f32 %v2121_v44 }
0x115e   :  { %v2962_v37 = vpop.f32.mrb[14].mxu0 }
0x115f   :  { %v1143_v38 = vpop.f32.mrb[15].mxu0 }
0x1160   :  { %v1144_v8 = vadd.f32 %v3020_v9, %v1143_v38 }
0x1162   :  { %v2964_v39 = vpop.f32.mrb[16].mxu0 }
0x1163   :  { %v2644_v40 = vpop.eup %2643  ;;  %v2966_v41 = vpop.f32.mrb[17].mxu0 }
0x1164   :  { %904 = vrot.lane.b32.xlu0 %v2644_v40, %s2726_s25  ;;  %v1149_v40 = vadd.f32 %v2962_v37, %v3020_v9 }
0x1165   :  { %v2646_v1 = vpop.eup %2645 }
0x1166   :  { %v2969_v42 = vpop.f32.mrb[18].mxu0  ;;  %v898_v45 = vadd.f32 1.0, %v2646_v1 }
0x1167   :  { %v2971_v43 = vpop.f32.mrb[19].mxu0 }
0x1168   :  { %2647 = vrcp.f32 %v898_v45 }
0x1172   :  { %v2648_v46 = vpop.eup %2647 }
0x1173   :  { %v902_v49 = vmul.f32 %v2648_v46, %v807_v62 }
0x11d6   :  { %v905_v47 = vpop.permute.xlu0 %904 }
0x11d7   :  { %v907_v48 = vmul.f32 %v2648_v46, %v905_v47 }
0x11d9   :  { %909 = vrot.lane.b32.xlu1 %v907_v48, %s2727_s3 }
0x124b   :  { %v910_v50 = vpop.permute.xlu1 %909 }
0x124c   :  { %v2974_v51 = vadd.f32 %v910_v50, %v902_v49 }
0x124e   :  { %2649 = vtanh.f32 %v2974_v51 }
0x1258   :  { %v2650_v52 = vpop.eup %2649 }
0x1259   :  { %915 = vrot.lane.b32.xlu0 %v2650_v52, %s2726_s25 }
0x12cb   :  { %v916_v59 = vpop.permute.xlu0 %915 }
0x12cc   :  { %v918_v60 = vmul.f32 %v2648_v46, %v916_v59 }
0x12ce   :  { %920 = vrot.lane.b32.xlu1 %v918_v60, %s2727_s3 }
0x1340   :  { %v921_v61 = vpop.permute.xlu1 %920 }
0x1341   :  { %924 = vst.msk [vmem:[#allocation2 + $0x30] sm:$0xff] %vm53_vm0, %v921_v61  ;;  %2365 = vmatmul.mubr.msk.f32.vlgmr.msra.gmra.mrb[8].mxu1 %vm53_vm0, %v921_v61 }
0x1342   :  { %2541 = vmatpush3.bf16.msra.mxu1 %v2984_v55  ;;  %2395 = vmatprep.mubr.msk.f32.mxu1 %vm2724_vm1, %v2725_v4 }
0x1343   :  { %2542 = vmatprep.subr.bf16.mxu1 %v2723_v2 }
0x1346   :  { %2544 = vmatpush3.bf16.msra.mxu1 %v2994_v58 }
0x1347   :  { %2545 = vmatprep.subr.bf16.mxu1 %v2723_v2 }
0x1348   :  { %v1045_v63 = vld [vmem:[#allocation2 + $0x30] sm:$0xff] }
0x1349   :  { %2396 = vmatmul.mubr.f32.vlgmr.msra.gmra.mrb[10].mxu1 %v2725_v4  ;;  %2384 = vmatprep.mubr.msk.f32.mxu0 %vm53_vm0, %v1045_v63 }
0x134a   :  { %2547 = vmatpush3.bf16.msra.mxu1 %v2984_v55  ;;  %2406 = vmatprep.mubr.msk.f32.mxu1 %vm2724_vm1, %v2725_v4 }
0x134b   :  { %2548 = vmatprep.subr.bf16.mxu1 %v2723_v2 }
0x134e   :  { %2550 = vmatpush3.bf16.msra.mxu1 %v2994_v58 }
0x134f   :  { %2557 = vmatprep.subr.bf16.mxu1 %v2723_v2 }
0x1414   :  { %v995_v5 = vpop.f32.mrb[8].mxu1 }
0x1415   :  { %v999_v6 = vadd.f32 %v995_v5, %v180_v3  ;;  %v2366_v7 = vpop.f32.mrb[9].mxu1 }
0x1417   :  { %v2123_v23 = vmul.f32 -1.442695, %v999_v6 }
0x141c   :  { %v1257_v10 = vpop.f32.mrb[10].mxu1 }
0x141d   :  { %v1261_v11 = vadd.f32 %v1257_v10, %v1144_v8  ;;  %v2397_v12 = vpop.f32.mrb[11].mxu1 }
0x141f   :  { %2651 = vtanh.f32 %v1261_v11  ;;  %v2133_v13 = vmul.f32 -1.442695, %v1261_v11 }
0x1421   :  { %2653 = vpow2.f32 %v2133_v13 }
0x1429   :  { %v2652_v14 = vpop.eup %2651 }
0x142a   :  { %1271 = vrot.lane.b32.xlu0 %v2652_v14, %s2726_s25 }
0x142b   :  { %v2654_v16 = vpop.eup %2653 }
0x142c   :  { %v1265_v0 = vadd.f32 1.0, %v2654_v16 }
0x142e   :  { %2655 = vrcp.f32 %v1265_v0 }
0x1438   :  { %v2656_v15 = vpop.eup %2655 }
0x1439   :  { %v1269_v18 = vmul.f32 0.0, %v2656_v15 }
0x149c   :  { %v1272_v62 = vpop.permute.xlu0 %1271 }
0x149d   :  { %v1274_v17 = vmul.f32 %v2656_v15, %v1272_v62 }
0x149f   :  { %1276 = vrot.lane.b32.xlu1 %v1274_v17, %s2727_s3 }
0x1511   :  { %v1277_v19 = vpop.permute.xlu1 %1276 }
0x1512   :  { %v1279_v20 = vadd.f32 %v1277_v19, %v1269_v18 }
0x1514   :  { %2657 = vtanh.f32 %v1279_v20 }
0x1515   :  { %2659 = vtanh.f32 %v999_v6  ;;  %v1154_v6 = vadd.f32 %v3020_v9, %v2966_v41 }
0x1516   :  { %2661 = vpow2.f32 %v2123_v23 }
0x151e   :  { %v2658_v21 = vpop.eup %2657 }
0x151f   :  { %1282 = vrot.lane.b32.xlu0 %v2658_v21, %s2726_s25  ;;  %v2660_v22 = vpop.eup %2659 }
0x1520   :  { %v2662_v24 = vpop.eup %2661 }
0x1521   :  { %v1003_v25 = vadd.f32 1.0, %v2662_v24 }
0x1523   :  { %1009 = vrot.lane.b32.xlu0 %v2660_v22, %s2726_s25  ;;  %2663 = vrcp.f32 %v1003_v25  ;;  %v1159_v22 = vadd.f32 %v2964_v39, %v3020_v9 }
0x152d   :  { %v2664_v28 = vpop.eup %2663 }
0x152e   :  { %v1007_v32 = vmul.f32 %v2664_v28, %v2974_v51 }
0x1591   :  { %v1283_v26 = vpop.permute.xlu0 %1282 }
0x1592   :  { %v3027_v27 = vmul.f32 %v2656_v15, %v1283_v26 }
0x1594   :  { %1300 = vrot.lane.b32.xlu1 %v3027_v27, %s2727_s3 }
0x1595   :  { %v1010_v29 = vpop.permute.xlu0 %1009 }
0x1596   :  { %v1012_v30 = vmul.f32 %v2664_v28, %v1010_v29 }
0x1598   :  { %1014 = vrot.lane.b32.xlu0 %v1012_v30, %s2727_s3 }
0x1606   :  { %v1301_v31 = vpop.permute.xlu1 %1300 }
0x1607   :  { %2407 = vmatmul.mubr.msk.f32.vlgmr.msra.gmra.mrb[12].mxu1 %vm53_vm0, %v1301_v31 }
0x1608   :  { %2559 = vmatpush3.bf16.msra.mxu1 %v2984_v55  ;;  %2428 = vmatprep.mubr.msk.f32.mxu1 %vm2724_vm1, %v2725_v4 }
0x1609   :  { %2560 = vmatprep.subr.bf16.mxu1 %v2723_v2 }
0x160a   :  { %v1015_v33 = vpop.permute.xlu0 %1014 }
0x160b   :  { %v1017_v34 = vadd.f32 %v1015_v33, %v1007_v32 }
0x160c   :  { %2562 = vmatpush3.bf16.msra.mxu1 %v2994_v58 }
0x160d   :  { %2665 = vtanh.f32 %v1017_v34  ;;  %2569 = vmatprep.subr.bf16.mxu1 %v2723_v2 }
0x1617   :  { %v2666_v35 = vpop.eup %2665 }
0x1618   :  { %1020 = vrot.lane.b32.xlu0 %v2666_v35, %s2726_s25 }
0x168a   :  { %v1021_v36 = vpop.permute.xlu0 %1020 }
0x168b   :  { %v1023_v38 = vmul.f32 %v2664_v28, %v1021_v36 }
0x168d   :  { %1025 = vrot.lane.b32.xlu0 %v1023_v38, %s2727_s3 }
0x16da   :  { %v1370_v44 = vpop.f32.mrb[12].mxu1 }
0x16db   :  { %v1374_v1 = vadd.f32 %v1370_v44, %v1149_v40  ;;  %v2408_v45 = vpop.f32.mrb[13].mxu1 }
0x16dd   :  { %2667 = vtanh.f32 %v1374_v1  ;;  %v2135_v49 = vmul.f32 -1.442695, %v1374_v1  ;;  %v1164_v1 = vadd.f32 %v3020_v9, %v2971_v43 }
0x16df   :  { %2669 = vpow2.f32 %v2135_v49 }
0x16e7   :  { %v2668_v46 = vpop.eup %2667 }
0x16e8   :  { %1384 = vrot.lane.b32.xlu1 %v2668_v46, %s2726_s25 }
0x16e9   :  { %v2670_v50 = vpop.eup %2669 }
0x16ea   :  { %v1378_v37 = vadd.f32 1.0, %v2670_v50 }
0x16ec   :  { %2671 = vrcp.f32 %v1378_v37 }
0x16f6   :  { %v2672_v51 = vpop.eup %2671 }
0x16f7   :  { %v1382_v54 = vmul.f32 %v2672_v51, %v1279_v20 }
0x16ff   :  { %v1026_v47 = vpop.permute.xlu0 %1025 }
0x1700   :  { %1029 = vst.msk [vmem:[#allocation2 + $0x38] sm:$0xff] %vm53_vm0, %v1026_v47 }
0x1707   :  { %v1046_v48 = vld [vmem:[#allocation2 + $0x38] sm:$0xff] }
0x1708   :  { %2385 = vmatmul.mubr.msk.f32.gmra.mrb[20].mxu0 %vm53_vm0, %v1046_v48 }
0x1709   :  { %2417 = vmatprep.mubr.msk.f32.mxu0 %vm2724_vm1, %v2725_v4 }
0x175a   :  { %v1385_v52 = vpop.permute.xlu1 %1384 }
0x175b   :  { %v1387_v53 = vmul.f32 %v2672_v51, %v1385_v52 }
0x175d   :  { %1389 = vrot.lane.b32.xlu1 %v1387_v53, %s2727_s3 }
0x17cf   :  { %v1390_v56 = vpop.permute.xlu1 %1389 }
0x17d0   :  { %v1392_v57 = vadd.f32 %v1390_v56, %v1382_v54 }
0x17d2   :  { %2673 = vtanh.f32 %v1392_v57 }
0x17db   :  { %v3050_v59 = vpop.f32.mrb[20].mxu0 }
0x17dc   :  { %v2674_v60 = vpop.eup %2673  ;;  %v3052_v61 = vpop.f32.mrb[21].mxu0 }
0x17dd   :  { %1395 = vrot.lane.b32.xlu1 %v2674_v60, %s2726_s25 }
0x184f   :  { %v1396_v63 = vpop.permute.xlu1 %1395 }
0x1850   :  { %v3055_v3 = vmul.f32 %v2672_v51, %v1396_v63 }
0x1852   :  { %1414 = vrot.lane.b32.xlu1 %v3055_v3, %s2727_s3 }
0x18c4   :  { %v1415_v5 = vpop.permute.xlu1 %1414 }
0x18c5   :  { %2418 = vmatmul.mubr.msk.f32.vlgmr.msra.gmra.mrb[22].mxu0 %vm53_vm0, %v1415_v5 }
0x18c6   :  { %2565 = vmatpush3.bf16.msra.mxu0 %v2984_v55  ;;  %2439 = vmatprep.mubr.msk.f32.mxu0 %vm2724_vm1, %v2725_v4 }
0x18c7   :  { %2566 = vmatprep.subr.bf16.mxu0 %v2723_v2 }
0x18ca   :  { %2568 = vmatpush3.bf16.msra.mxu0 %v2994_v58 }
0x18cb   :  { %2575 = vmatprep.subr.bf16.mxu0 %v2723_v2 }
0x1998   :  { %v1484_v7 = vpop.f32.mrb[22].mxu0 }
0x1999   :  { %v1488_v8 = vadd.f32 %v1484_v7, %v1154_v6  ;;  %v2419_v10 = vpop.f32.mrb[23].mxu0  ;;  %v1169_v6 = vadd.f32 %v2969_v42, %v3020_v9 }
0x199b   :  { %2675 = vtanh.f32 %v1488_v8  ;;  %v2138_v12 = vmul.f32 -1.442695, %v1488_v8 }
0x199d   :  { %2677 = vpow2.f32 %v2138_v12 }
0x19a5   :  { %v2676_v11 = vpop.eup %2675 }
0x19a6   :  { %1498 = vrot.lane.b32.xlu0 %v2676_v11, %s2726_s25 }
0x19a7   :  { %v2678_v14 = vpop.eup %2677 }
0x19a8   :  { %v1492_v13 = vadd.f32 1.0, %v2678_v14 }
0x19aa   :  { %2679 = vrcp.f32 %v1492_v13 }
0x19b4   :  { %v2680_v16 = vpop.eup %2679 }
0x19b5   :  { %v1496_v62 = vmul.f32 %v2680_v16, %v1392_v57 }
0x1a18   :  { %v1499_v0 = vpop.permute.xlu0 %1498 }
0x1a19   :  { %v1501_v15 = vmul.f32 %v2680_v16, %v1499_v0 }
0x1a1b   :  { %1503 = vrot.lane.b32.xlu1 %v1501_v15, %s2727_s3 }
0x1a8d   :  { %v1504_v17 = vpop.permute.xlu1 %1503 }
0x1a8e   :  { %v1506_v41 = vadd.f32 %v1504_v17, %v1496_v62 }
0x1a90   :  { %2681 = vtanh.f32 %v1506_v41 }
0x1a9a   :  { %v2682_v18 = vpop.eup %2681 }
0x1a9b   :  { %1509 = vrot.lane.b32.xlu0 %v2682_v18, %s2726_s25 }
0x1b0d   :  { %v1510_v19 = vpop.permute.xlu0 %1509 }
0x1b0e   :  { %v3071_v20 = vmul.f32 %v2680_v16, %v1510_v19 }
0x1b10   :  { %1528 = vrot.lane.b32.xlu1 %v3071_v20, %s2727_s3 }
0x1b82   :  { %v1529_v21 = vpop.permute.xlu1 %1528 }
0x1b83   :  { %2429 = vmatmul.mubr.msk.f32.vlgmr.msra.gmra.mrb[14].mxu1 %vm53_vm0, %v1529_v21 }
0x1b84   :  { %2571 = vmatpush3.bf16.msra.mxu1 %v2984_v55  ;;  %2450 = vmatprep.mubr.msk.f32.mxu1 %vm2724_vm1, %v2725_v4 }
0x1b85   :  { %2572 = vmatprep.subr.bf16.mxu1 %v2723_v2 }
0x1b88   :  { %2574 = vmatpush3.bf16.msra.mxu1 %v2994_v58 }
0x1b89   :  { %2581 = vmatprep.subr.bf16.mxu1 %v2723_v2 }
0x1c56   :  { %v1598_v23 = vpop.f32.mrb[14].mxu1 }
0x1c57   :  { %v1602_v24 = vadd.f32 %v1598_v23, %v1159_v22  ;;  %v2430_v25 = vpop.f32.mrb[15].mxu1 }
0x1c59   :  { %2683 = vtanh.f32 %v1602_v24  ;;  %v2141_v28 = vmul.f32 -1.442695, %v1602_v24 }
0x1c5b   :  { %2685 = vpow2.f32 %v2141_v28 }
0x1c63   :  { %v2684_v26 = vpop.eup %2683 }
0x1c64   :  { %1612 = vrot.lane.b32.xlu0 %v2684_v26, %s2726_s25 }
0x1c65   :  { %v2686_v29 = vpop.eup %2685 }
0x1c66   :  { %v1606_v30 = vadd.f32 1.0, %v2686_v29 }
0x1c68   :  { %2687 = vrcp.f32 %v1606_v30 }
0x1c72   :  { %v2688_v31 = vpop.eup %2687 }
0x1c73   :  { %v1610_v34 = vmul.f32 %v2688_v31, %v1506_v41  ;;  %v1174_v41 = vadd.f32 %v3020_v9, %v3052_v61 }
0x1cd6   :  { %v1613_v32 = vpop.permute.xlu0 %1612 }
0x1cd7   :  { %v1615_v33 = vmul.f32 %v2688_v31, %v1613_v32 }
0x1cd9   :  { %1617 = vrot.lane.b32.xlu1 %v1615_v33, %s2727_s3 }
0x1d4b   :  { %v1618_v35 = vpop.permute.xlu1 %1617 }
0x1d4c   :  { %v1620_v39 = vadd.f32 %v1618_v35, %v1610_v34 }
0x1d4e   :  { %2689 = vtanh.f32 %v1620_v39 }
0x1d58   :  { %v2690_v36 = vpop.eup %2689 }
0x1d59   :  { %1623 = vrot.lane.b32.xlu0 %v2690_v36, %s2726_s25  ;;  %v1179_v36 = vadd.f32 %v3050_v59, %v3020_v9 }
0x1dcb   :  { %v1624_v38 = vpop.permute.xlu0 %1623 }
0x1dcc   :  { %v3087_v40 = vmul.f32 %v2688_v31, %v1624_v38 }
0x1dce   :  { %1642 = vrot.lane.b32.xlu1 %v3087_v40, %s2727_s3 }
0x1e40   :  { %v1643_v44 = vpop.permute.xlu1 %1642 }
0x1e41   :  { %2440 = vmatmul.mubr.msk.f32.vlgmr.msra.gmra.mrb[24].mxu0 %vm53_vm0, %v1643_v44 }
0x1e42   :  { %2577 = vmatpush3.bf16.msra.mxu0 %v2984_v55  ;;  %2461 = vmatprep.mubr.msk.f32.mxu0 %vm2724_vm1, %v2725_v4 }
0x1e43   :  { %2578 = vmatprep.subr.bf16.mxu0 %v2723_v2 }
0x1e46   :  { %2580 = vmatpush3.bf16.msra.mxu0 %v2994_v58 }
0x1f14   :  { %v1712_v45 = vpop.f32.mrb[24].mxu0 }
0x1f15   :  { %v1716_v46 = vadd.f32 %v1712_v45, %v1164_v1  ;;  %v2441_v47 = vpop.f32.mrb[25].mxu0  ;;  %v29_v45 = vld [vmem:[%s3194_s7] sm:$0xff] }
0x1f16   :  { %vm1286_vm2 = vcmp.gt.s32.totalorder %v29_v45, 0  ;;  %vm1627_vm3 = vcmp.gt.s32.totalorder %v29_v45, 3  ;;  %vm1855_vm4 = vcmp.gt.s32.totalorder %v29_v45, 5  ;;  %vm2083_vm5 = vcmp.gt.s32.totalorder %v29_v45, 7 }
0x1f17   :  { %2691 = vtanh.f32 %v1716_v46  ;;  %v2144_v49 = vmul.f32 -1.442695, %v1716_v46  ;;  %vm1399_vm6 = vcmp.gt.s32.totalorder %v29_v45, 1  ;;  %vm1513_vm7 = vcmp.gt.s32.totalorder %v29_v45, 2 }
0x1f18   :  { %vm1741_vm8 = vcmp.gt.s32.totalorder %v29_v45, 4  ;;  %vm1969_vm9 = vcmp.gt.s32.totalorder %v29_v45, 6 }
0x1f19   :  { %2693 = vpow2.f32 %v2144_v49 }
0x1f21   :  { %v2692_v48 = vpop.eup %2691 }
0x1f22   :  { %1726 = vrot.lane.b32.xlu0 %v2692_v48, %s2726_s25 }
0x1f23   :  { %v2694_v50 = vpop.eup %2693 }
0x1f24   :  { %v1720_v37 = vadd.f32 1.0, %v2694_v50 }
0x1f26   :  { %2695 = vrcp.f32 %v1720_v37 }
0x1f30   :  { %v2696_v51 = vpop.eup %2695 }
0x1f31   :  { %v1724_v54 = vmul.f32 %v2696_v51, %v1620_v39  ;;  %v2728_v39 = vmov 0  }
0x1f32   :  { %2593 = vset.pattern.permute.xlu0 %v2728_v39  ;;  %2594 = vset.pattern.permute.xlu1 %v2728_v39  ;;  %v1287_v47 = vsel %vm1286_vm2, 1, %v2728_v39  ;;  %v1628_v48 = vsel %vm1627_vm3, 1, %v2728_v39  ;;  %v1856_v49 = vsel %vm1855_vm4, 1, %v2728_v39  ;;  %v2084_v9 = vsel %vm2083_vm5, 1, %v2728_v39 }
0x1f94   :  { %v1727_v52 = vpop.permute.xlu0 %1726 }
0x1f95   :  { %v1729_v53 = vmul.f32 %v2696_v51, %v1727_v52 }
0x1f97   :  { %1731 = vrot.lane.b32.xlu1 %v1729_v53, %s2727_s3 }
0x2009   :  { %v1732_v56 = vpop.permute.xlu1 %1731 }
0x200a   :  { %v1734_v43 = vadd.f32 %v1732_v56, %v1724_v54  ;;  %v1400_v54 = vsel %vm1399_vm6, 1, %v2728_v39  ;;  %v1514_v56 = vsel %vm1513_vm7, 1, %v2728_v39 }
0x200c   :  { %2697 = vtanh.f32 %v1734_v43 }
0x2016   :  { %v2698_v57 = vpop.eup %2697 }
0x2017   :  { %1737 = vrot.lane.b32.xlu0 %v2698_v57, %s2726_s25  ;;  %v1970_v57 = vsel %vm1969_vm9, 1, %v2728_v39 }
0x2089   :  { %v1738_v60 = vpop.permute.xlu0 %1737 }
0x208a   :  { %v3102_v63 = vmul.f32 %v2696_v51, %v1738_v60 }
0x208c   :  { %1756 = vrot.lane.b32.xlu1 %v3102_v63, %s2727_s3 }
0x20fe   :  { %v1757_v5 = vpop.permute.xlu1 %1756 }
0x20ff   :  { %2451 = vmatmul.mubr.msk.f32.vlgmr.msra.gmra.mrb[16].mxu1 %vm53_vm0, %v1757_v5 }
0x2100   :  { %2583 = vmatpush3.bf16.msra.mxu1 %v2984_v55  ;;  %2472 = vmatprep.mubr.msk.f32.mxu1 %vm2724_vm1, %v2725_v4 }
0x2101   :  { %2584 = vmatprep.subr.bf16.mxu1 %v2723_v2 }
0x2104   :  { %2586 = vmatpush3.bf16.msra.mxu1 %v2994_v58 }
0x21d2   :  { %v1826_v7 = vpop.f32.mrb[16].mxu1 }
0x21d3   :  { %v1830_v8 = vadd.f32 %v1826_v7, %v1169_v6  ;;  %v2452_v10 = vpop.f32.mrb[17].mxu1 }
0x21d5   :  { %2699 = vtanh.f32 %v1830_v8  ;;  %v2147_v12 = vmul.f32 -1.442695, %v1830_v8 }
0x21d7   :  { %2701 = vpow2.f32 %v2147_v12 }
0x21df   :  { %v2700_v11 = vpop.eup %2699 }
0x21e0   :  { %1840 = vrot.lane.b32.xlu0 %v2700_v11, %s2726_s25 }
0x21e1   :  { %v2702_v55 = vpop.eup %2701 }
0x21e2   :  { %v1834_v14 = vadd.f32 1.0, %v2702_v55 }
0x21e4   :  { %2703 = vrcp.f32 %v1834_v14 }
0x21ee   :  { %v2704_v4 = vpop.eup %2703 }
0x21ef   :  { %v1838_v58 = vmul.f32 %v2704_v4, %v1734_v43  ;;  %v1742_v43 = vsel %vm1741_vm8, 1, %v2728_v39 }
0x2252   :  { %v1841_v13 = vpop.permute.xlu0 %1840 }
0x2253   :  { %v1843_v2 = vmul.f32 %v2704_v4, %v1841_v13 }
0x2255   :  { %1845 = vrot.lane.b32.xlu1 %v1843_v2, %s2727_s3 }
0x22c7   :  { %v1846_v16 = vpop.permute.xlu1 %1845 }
0x22c8   :  { %v1848_v42 = vadd.f32 %v1846_v16, %v1838_v58 }
0x22ca   :  { %2705 = vtanh.f32 %v1848_v42 }
0x22d4   :  { %v2706_v0 = vpop.eup %2705 }
0x22d5   :  { %1851 = vrot.lane.b32.xlu0 %v2706_v0, %s2726_s25 }
0x2347   :  { %v1852_v15 = vpop.permute.xlu0 %1851 }
0x2348   :  { %v3117_v62 = vmul.f32 %v2704_v4, %v1852_v15 }
0x234a   :  { %1870 = vrot.lane.b32.xlu1 %v3117_v62, %s2727_s3 }
0x23bc   :  { %v1871_v17 = vpop.permute.xlu1 %1870 }
0x23bd   :  { %2462 = vmatmul.mubr.msk.f32.vlgmr.msra.gmra.mrb[26].mxu0 %vm53_vm0, %v1871_v17 }
0x2490   :  { %v1940_v18 = vpop.f32.mrb[26].mxu0 }
0x2491   :  { %v1944_v19 = vadd.f32 %v1940_v18, %v1174_v41  ;;  %v2463_v21 = vpop.f32.mrb[27].mxu0 }
0x2493   :  { %2707 = vtanh.f32 %v1944_v19  ;;  %v2150_v23 = vmul.f32 -1.442695, %v1944_v19 }
0x2495   :  { %2709 = vpow2.f32 %v2150_v23 }
0x249d   :  { %v2708_v22 = vpop.eup %2707 }
0x249e   :  { %1954 = vrot.lane.b32.xlu0 %v2708_v22, %s2726_s25 }
0x249f   :  { %v2710_v24 = vpop.eup %2709 }
0x24a0   :  { %v1948_v25 = vadd.f32 1.0, %v2710_v24 }
0x24a2   :  { %2711 = vrcp.f32 %v1948_v25 }
0x24ac   :  { %v2712_v26 = vpop.eup %2711 }
0x24ad   :  { %v1952_v30 = vmul.f32 %v2712_v26, %v1848_v42 }
0x2510   :  { %v1955_v28 = vpop.permute.xlu0 %1954 }
0x2511   :  { %v1957_v29 = vmul.f32 %v2712_v26, %v1955_v28 }
0x2513   :  { %1959 = vrot.lane.b32.xlu1 %v1957_v29, %s2727_s3 }
0x2585   :  { %v1960_v31 = vpop.permute.xlu1 %1959 }
0x2586   :  { %v1962_v61 = vadd.f32 %v1960_v31, %v1952_v30 }
0x2588   :  { %2713 = vtanh.f32 %v1962_v61 }
0x2592   :  { %v2714_v32 = vpop.eup %2713 }
0x2593   :  { %1965 = vrot.lane.b32.xlu0 %v2714_v32, %s2726_s25 }
0x2605   :  { %v1966_v33 = vpop.permute.xlu0 %1965 }
0x2606   :  { %v3127_v34 = vmul.f32 %v2712_v26, %v1966_v33 }
0x2608   :  { %1984 = vrot.lane.b32.xlu1 %v3127_v34, %s2727_s3 }
0x267a   :  { %v1985_v35 = vpop.permute.xlu1 %1984 }
0x267b   :  { %2473 = vmatmul.mubr.msk.f32.vlgmr.msra.gmra.mrb[18].mxu1 %vm53_vm0, %v1985_v35 }
0x274e   :  { %v2054_v38 = vpop.f32.mrb[18].mxu1 }
0x274f   :  { %v2058_v44 = vadd.f32 %v2054_v38, %v1179_v36  ;;  %v2474_v1 = vpop.f32.mrb[19].mxu1 }
0x2751   :  { %2715 = vtanh.f32 %v2058_v44  ;;  %v2153_v59 = vmul.f32 -1.442695, %v2058_v44 }
0x2753   :  { %2717 = vpow2.f32 %v2153_v59 }
0x275b   :  { %v2716_v46 = vpop.eup %2715 }
0x275c   :  { %2068 = vrot.lane.b32.xlu0 %v2716_v46, %s2726_s25 }
0x275d   :  { %v2718_v50 = vpop.eup %2717 }
0x275e   :  { %v2062_v37 = vadd.f32 1.0, %v2718_v50 }
0x2760   :  { %1289 = vperm.xlu0 %2593, %v1287_v47   ;;  %2719 = vrcp.f32 %v2062_v37 }
0x2764   :  { %1630 = vperm.xlu0 %2593, %v1628_v48  }
0x2768   :  { %1858 = vperm.xlu0 %2593, %v1856_v49  }
0x276a   :  { %v2720_v51 = vpop.eup %2719 }
0x276b   :  { %v2066_v6 = vmul.f32 %v2720_v51, %v1962_v61 }
0x276c   :  { %2086 = vperm.xlu0 %2593, %v2084_v9  }
0x27ce   :  { %v2069_v52 = vpop.permute.xlu0 %2068 }
0x27cf   :  { %v2071_v53 = vmul.f32 %v2720_v51, %v2069_v52 }
0x27d1   :  { %2073 = vrot.lane.b32.xlu1 %v2071_v53, %s2727_s3 }
0x27d5   :  { %1402 = vperm.xlu1 %2594, %v1400_v54  }
0x27d9   :  { %1516 = vperm.xlu1 %2594, %v1514_v56  }
0x27dd   :  { %1744 = vperm.xlu1 %2594, %v1742_v43  }
0x27df   :  { %v1290_v60 = vpop.permute.xlu0 %1289 }
0x27e0   :  { %vm1291_vm10 = vcmp.eq.s32.totalorder %v1290_v60, 1 }
0x27e1   :  { %v1292_v5 = vsel %vm1291_vm10, %v3027_v27, 0.0  ;;  %1972 = vperm.xlu1 %2594, %v1970_v57  }
0x27e2   :  { %1294 = vrot.lane.b32.xlu0 %v1292_v5, %s2727_s3 }
0x27e3   :  { %v1631_v8 = vpop.permute.xlu0 %1630 }
0x27e4   :  { %vm1632_vm12 = vcmp.eq.s32.totalorder %v1631_v8, 1 }
0x27e5   :  { %v1633_v2 = vsel %vm1632_vm12, %v3087_v40, 0.0 }
0x27e7   :  { %v1859_v11 = vpop.permute.xlu0 %1858 }
0x27e8   :  { %vm1860_vm14 = vcmp.eq.s32.totalorder %v1859_v11, 1 }
0x27e9   :  { %v1861_v42 = vsel %vm1860_vm14, %v3117_v62, 0.0 }
0x27eb   :  { %v2087_v12 = vpop.permute.xlu0 %2086 }
0x27ec   :  { %vm2088_vm2 = vcmp.eq.s32.totalorder %v2087_v12, 1 }
0x2843   :  { %v2074_v7 = vpop.permute.xlu1 %2073 }
0x2844   :  { %v2076_v10 = vadd.f32 %v2074_v7, %v2066_v6 }
0x2846   :  { %2721 = vtanh.f32 %v2076_v10 }
0x2850   :  { %v2722_v55 = vpop.eup %2721 }
0x2851   :  { %2079 = vrot.lane.b32.xlu1 %v2722_v55, %s2726_s25 }
0x2854   :  { %v1295_v14 = vpop.permute.xlu0 %1294  ;;  %v1403_v4 = vpop.permute.xlu1 %1402 }
0x2855   :  { %1297 = vst.msk [vmem:[%s3195_s8] sm:$0xff] %vm53_vm0, %v1295_v14  ;;  %vm1404_vm11 = vcmp.eq.s32.totalorder %v1403_v4, 1 }
0x2856   :  { %v1405_v27 = vsel %vm1404_vm11, %v3055_v3, 0.0 }
0x2857   :  { %1407 = vrot.lane.b32.xlu1 %v1405_v27, %s2727_s3 }
0x2858   :  { %v1517_v13 = vpop.permute.xlu1 %1516 }
0x2859   :  { %vm1518_vm13 = vcmp.eq.s32.totalorder %v1517_v13, 1 }
0x285a   :  { %v1519_v58 = vsel %vm1518_vm13, %v3071_v20, 0.0 }
0x285b   :  { %1521 = vrot.lane.b32.xlu0 %v1519_v58, %s2727_s3  ;;  %1635 = vrot.lane.b32.xlu1 %v1633_v2, %s2727_s3 }
0x285c   :  { %v1745_v16 = vpop.permute.xlu1 %1744 }
0x285d   :  { %vm1746_vm15 = vcmp.eq.s32.totalorder %v1745_v16, 1 }
0x285e   :  { %v1747_v3 = vsel %vm1746_vm15, %v3102_v63, 0.0 }
0x285f   :  { %1749 = vrot.lane.b32.xlu0 %v1747_v3, %s2727_s3  ;;  %1863 = vrot.lane.b32.xlu1 %v1861_v42, %s2727_s3 }
0x2860   :  { %v1973_v0 = vpop.permute.xlu1 %1972 }
0x2861   :  { %vm1974_vm1 = vcmp.eq.s32.totalorder %v1973_v0, 1 }
0x2862   :  { %v1975_v40 = vsel %vm1974_vm1, %v3127_v34, 0.0 }
0x2863   :  { %1977 = vrot.lane.b32.xlu0 %v1975_v40, %s2727_s3 }
0x28c3   :  { %v2080_v20 = vpop.permute.xlu1 %2079 }
0x28c4   :  { %v2082_v15 = vmul.f32 %v2720_v51, %v2080_v20 }
0x28c6   :  { %v2089_v17 = vsel %vm2088_vm2, %v2082_v15, 0.0 }
0x28c7   :  { %2091 = vrot.lane.b32.xlu1 %v2089_v17, %s2727_s3 }
0x28c9   :  { %v1408_v41 = vpop.permute.xlu1 %1407 }
0x28ca   :  { %2136 = vst.msk [vmem:[%s3195_s8 + $0x8] sm:$0xff] %vm53_vm0, %v1408_v41 }
0x28cd   :  { %v1522_v63 = vpop.permute.xlu0 %1521  ;;  %v1636_v62 = vpop.permute.xlu1 %1635 }
0x28ce   :  { %2139 = vst.msk [vmem:[%s3195_s8 + $0x10] sm:$0xff] %vm53_vm0, %v1522_v63  ;;  %2142 = vst.msk [vmem:[%s3195_s8 + $0x18] sm:$0xff] %vm53_vm0, %v1636_v62 }
0x28d1   :  { %v1750_v18 = vpop.permute.xlu0 %1749  ;;  %v1864_v19 = vpop.permute.xlu1 %1863 }
0x28d2   :  { %2145 = vst.msk [vmem:[%s3195_s8 + $0x20] sm:$0xff] %vm53_vm0, %v1750_v18  ;;  %2148 = vst.msk [vmem:[%s3195_s8 + $0x28] sm:$0xff] %vm53_vm0, %v1864_v19 }
0x28d5   :  { %v1978_v21 = vpop.permute.xlu0 %1977 }
0x28d6   :  { %2151 = vst.msk [vmem:[%s3195_s8 + $0x30] sm:$0xff] %vm53_vm0, %v1978_v21 }
0x2939   :  { %v2092_v22 = vpop.permute.xlu1 %2091 }
0x293a   :  { %2154 = vst.msk [vmem:[%s3195_s8 + $0x38] sm:$0xff] %vm53_vm0, %v2092_v22 }

</bundles_post_ra>
